<compile_context>
chip_gen: v7x
topology: tpu7x:2x2x1
jax: 0.10.0
libtpu: 0.0.40
codegen_flags: <defaults>
</compile_context>

<pallas_src>
import functools
import numpy as np

import jax
import jax.numpy as jnp
from jax.experimental import pallas as pl
from jax.experimental.pallas import tpu as pltpu

# ----------------------- module hyper-params / shapes -----------------------
DIMS = 8           # "dims"        -> Cout of the dynamic conv
INPUT_DIM = 4      # "input_dim"   -> Cin of the dynamic conv
NUM_WEIGHTS = 4    # "num_weights" -> number of expert kernels
N = 2              # batch
T = H = W = 8      # 3D spatial extent of x
STD_HW = 16        # spatial extent of std_x (>= 9 so the two 5x5 convs fit)
EPOCH = 3
EPS = 1e-5

THW = T * H * W                 # 512 flattened spatial positions (lane axis)
CIN27 = INPUT_DIM * 27
PAD = H * W + W + 1             # 73 = max |flat offset| of a 3x3x3 tap
NTAPS = 27
_TAPS = [(kt - 1, kh - 1, kw - 1)
         for kt in range(3) for kh in range(3) for kw in range(3)]


def get_temperature(epoch):
    return 30.0 - 2.9 * epoch if epoch < 10 else 1.0


# ------------------------------ fused Pallas kernel -------------------------
def _fused_dynconv_bn_relu_kernel(phi_ref, xpad_ref, wspread_ref, aux_ref,
                                  out_ref, patch_ref):
    # phi_ref     : (n, E)                    SMEM  softmax gates
    # xpad_ref    : (n*Cin, 2*PAD+THW)        VMEM  flattened x, batch packed in sublanes
    # wspread_ref : (E, n*DIMS, KDIM)         VMEM  block-diagonal spread expert kernels
    # aux_ref     : (E+2, DIMS, 1)            VMEM  [expert biases | bn_gamma | bn_beta]
    # out_ref     : (n*DIMS, THW)             VMEM  final activations (lane-dense)
    # patch_ref   : (KDIM, THW) bf16          VMEM scratch: im2col patch matrix
    n = out_ref.shape[0] // DIMS
    krows = xpad_ref.shape[0]              # n * Cin
    kdim = patch_ref.shape[0]              # 2*ceil(27/2) * n * Cin
    npair = kdim // (2 * krows)

    # Decompose the flat output position into (t, h, w) once (shifts/ands: pow-2 extents).
    s_idx = jax.lax.broadcasted_iota(jnp.int32, (1, THW), 1)
    t_i = s_idx >> int(np.log2(H * W))
    h_i = (s_idx >> int(np.log2(W))) & (H - 1)
    w_i = s_idx & (W - 1)

    def tap_window(tap):
        # Shifted window of the flattened, zero-padded batch for one 3x3x3 tap: (n*Cin, THW)
        if tap >= NTAPS:                               # pad tap -> all-zero rows
            return jnp.zeros((krows, THW), jnp.float32)
        dt, dh, dw = _TAPS[tap]
        d = dt * H * W + dh * W + dw
        win = xpad_ref[:, pl.ds(PAD + d, THW)]
        # Zero lanes whose (t,h,w) neighbour falls outside the volume (conv zero padding).
        cond = None
        for idx, off, ext in ((t_i, dt, T), (h_i, dh, H), (w_i, dw, W)):
            if off < 0:
                c = idx >= -off
            elif off > 0:
                c = idx < ext - off
            else:
                continue
            cond = c if cond is None else (cond & c)
        if cond is not None:
            win = jnp.where(cond, win, 0.0)
        return win

    # ---- im2col: build the (KDIM, THW) bf16 patch matrix in VMEM --------------------
    # Taps processed in pairs so every store is a full, 16-row-aligned bf16 tile.
    for pair in range(npair):
        blk = jnp.concatenate([tap_window(2 * pair), tap_window(2 * pair + 1)], axis=0)
        patch_ref[pl.ds(pair * 2 * krows, 2 * krows), :] = blk.astype(jnp.bfloat16)

    # ---- mix expert weights / biases once per sample (gates from SMEM) --------------
    wrows = []
    brows = []
    for b in range(n):
        wb = phi_ref[b, 0] * wspread_ref[0, pl.ds(b * DIMS, DIMS), :]   # (DIMS, KDIM)
        bb = phi_ref[b, 0] * aux_ref[0]                                 # (DIMS, 1)
        for e in range(1, NUM_WEIGHTS):
            wb = wb + phi_ref[b, e] * wspread_ref[e, pl.ds(b * DIMS, DIMS), :]
            bb = bb + phi_ref[b, e] * aux_ref[e]
        wrows.append(wb)
        brows.append(bb)
    wmixed = jnp.concatenate(wrows, axis=0).astype(jnp.bfloat16)        # (n*DIMS, KDIM)
    dynb = jnp.concatenate(brows, axis=0)                               # (n*DIMS, 1) f32

    # ---- one MXU dot for the whole batch (bf16 operands, f32 accumulation) ----------
    acc = jnp.dot(wmixed, patch_ref[...], preferred_element_type=jnp.float32)  # (n*DIMS, THW)

    # ---- BatchNorm3d (training batch stats, biased var) with dynb folded in ---------
    s1 = jnp.sum(acc, axis=1, keepdims=True)                            # (n*DIMS, 1)
    s2 = jnp.sum(acc * acc, axis=1, keepdims=True)
    fthw = float(THW)
    s1y = s1 + fthw * dynb                                              # sums of y = acc+dynb
    s2y = s2 + 2.0 * dynb * s1 + fthw * dynb * dynb                     # sums of y^2

    chan_s1 = s1y[0:DIMS]
    chan_s2 = s2y[0:DIMS]
    for b in range(1, n):
        chan_s1 = chan_s1 + s1y[b * DIMS:(b + 1) * DIMS]
        chan_s2 = chan_s2 + s2y[b * DIMS:(b + 1) * DIMS]

    inv_cnt = 1.0 / float(n * THW)
    mean = chan_s1 * inv_cnt                                            # (DIMS, 1)
    var = chan_s2 * inv_cnt - mean * mean
    scale_c = aux_ref[NUM_WEIGHTS] * jax.lax.rsqrt(var + EPS)           # gamma * rsqrt(var+eps)
    beta_c = aux_ref[NUM_WEIGHTS + 1]

    scale = jnp.concatenate([scale_c] * n, axis=0)                      # (n*DIMS, 1)
    mean_rows = jnp.concatenate([mean] * n, axis=0)
    beta_rows = jnp.concatenate([beta_c] * n, axis=0)
    shift = scale * (dynb - mean_rows) + beta_rows

    # Fused BN + ReLU, single lane-dense store.
    out_ref[...] = jnp.maximum(acc * scale + shift, 0.0)


# ------------------------------ forward (Pallas) ----------------------------
@functools.partial(jax.jit, static_argnums=1)
def forward_pallas(x, epochs_num, std_x, params):
    n = x.shape[0]

    # ---- gating branch (squeeze/expand): tiny 5x5 convs, left to XLA ----
    def conv2d(inp, w, b):
        out = jax.lax.conv_general_dilated(
            inp, w, (1, 1), "VALID", dimension_numbers=("NCHW", "OIHW", "NCHW"))
        return out + b[None, :, None, None]

    h = jnp.maximum(conv2d(std_x, params["w1"], params["b1"]), 0.0)
    h = jnp.maximum(conv2d(h, params["w2"], params["b2"]), 0.0)
    pooled = jnp.max(h, axis=(2, 3))                                  # (n, 32)
    logits = pooled @ params["wl"].T + params["bl"]                   # (n, E)
    tau = get_temperature(epochs_num)
    phi = jax.nn.softmax(logits / tau, axis=1)                        # (n, E)

    # ---- host-side layout prep for the fused kernel ----
    # Batch packed into sublanes, zero-padded along the flat spatial axis.
    xpad = jnp.pad(x.reshape(n * INPUT_DIM, THW), ((0, 0), (PAD, PAD)))

    kdim = 2 * ((NTAPS + 1) // 2) * n * INPUT_DIM       # 27 taps padded to 28 -> 224

    # Expert kernels, tap-major then spread block-diagonally over the batch:
    #   wspread[e, b*DIMS+o, tap*(n*Cin) + b*Cin + c] = weights[e, o, c, kt, kh, kw]
    w_tap = params["weights"].transpose(0, 3, 4, 5, 1, 2).reshape(
        NUM_WEIGHTS, NTAPS, DIMS, INPUT_DIM)
    wspread = jnp.einsum("etoc,bB->ebotBc", w_tap, jnp.eye(n, dtype=jnp.float32))
    wspread = wspread.reshape(NUM_WEIGHTS, n * DIMS, NTAPS * n * INPUT_DIM)
    wspread = jnp.pad(wspread, ((0, 0), (0, 0), (0, kdim - NTAPS * n * INPUT_DIM)))

    # Coalesced tiny per-channel params: [expert biases | bn_gamma | bn_beta]
    aux = jnp.concatenate([params["biases"],
                           params["bn_gamma"][None, :],
                           params["bn_beta"][None, :]], axis=0)
    aux = aux.reshape(NUM_WEIGHTS + 2, DIMS, 1)

    out = pl.pallas_call(
        _fused_dynconv_bn_relu_kernel,
        out_shape=jax.ShapeDtypeStruct((n * DIMS, THW), jnp.float32),
        in_specs=[
            pl.BlockSpec(memory_space=pltpu.MemorySpace.SMEM),   # phi gates (scalars)
            pl.BlockSpec(memory_space=pltpu.MemorySpace.VMEM),   # padded, packed x
            pl.BlockSpec(memory_space=pltpu.MemorySpace.VMEM),   # spread expert weights
            pl.BlockSpec(memory_space=pltpu.MemorySpace.VMEM),   # biases + bn gamma/beta
        ],
        out_specs=pl.BlockSpec(memory_space=pltpu.MemorySpace.VMEM),
        scratch_shapes=[pltpu.VMEM((kdim, THW), jnp.bfloat16)],  # im2col patch matrix
    )(phi, xpad, wspread, aux)

    return out.reshape(n, DIMS, T, H, W)


# ------------------------------ pure-JAX reference ---------------------------
def _im2col3d(x):
    # x: (n, c, t, h, w) -> (n, c*27, t*h*w), padding=1, stride=1, 3x3x3
    n, c, t, h, w = x.shape
    xp = jnp.pad(x, ((0, 0), (0, 0), (1, 1), (1, 1), (1, 1)))
    cols = [xp[:, :, kt:kt + t, kh:kh + h, kw:kw + w]
            for kt in range(3) for kh in range(3) for kw in range(3)]
    p = jnp.stack(cols, axis=2)            # (n, c, 27, t, h, w)
    return p.reshape(n, c * 27, t * h * w)


def _reference(x, epochs_num, std_x, params):
    n = x.shape[0]

    def conv2d(inp, w, b):
        out = jax.lax.conv_general_dilated(
            inp, w, (1, 1), "VALID", dimension_numbers=("NCHW", "OIHW", "NCHW"))
        return out + b[None, :, None, None]

    h = jnp.maximum(conv2d(std_x, params["w1"], params["b1"]), 0.0)
    h = jnp.maximum(conv2d(h, params["w2"], params["b2"]), 0.0)
    pooled = jnp.max(h, axis=(2, 3))
    logits = pooled @ params["wl"].T + params["bl"]
    tau = get_temperature(epochs_num)
    phi = jax.nn.softmax(logits / tau, axis=1)

    dynw = jnp.einsum("bn,noc->boc", phi, params["weights"].reshape(NUM_WEIGHTS, DIMS, CIN27))
    dynb = jnp.einsum("bn,no->bo", phi, params["biases"])

    patches = _im2col3d(x)                                     # (n, Cin*27, THW)
    y = jnp.einsum("bok,bkp->bop", dynw, patches)
    y = y.reshape(n, DIMS, T, H, W) + dynb[:, :, None, None, None]

    mean = jnp.mean(y, axis=(0, 2, 3, 4), keepdims=True)
    var = jnp.var(y, axis=(0, 2, 3, 4), keepdims=True)
    y = (y - mean) / jnp.sqrt(var + EPS) * params["bn_gamma"][None, :, None, None, None] \
        + params["bn_beta"][None, :, None, None, None]
    return jnp.maximum(y, 0.0)


# ------------------------------ parameter init -------------------------------
def init_params(key):
    ks = jax.random.split(key, 8)
    return dict(
        weights=jax.random.normal(ks[0], (NUM_WEIGHTS, DIMS, INPUT_DIM, 3, 3, 3), jnp.float32)
                * (2.0 / (DIMS * INPUT_DIM * 27)) ** 0.5,
        biases=jax.random.normal(ks[1], (NUM_WEIGHTS, DIMS), jnp.float32),
        w1=jax.random.normal(ks[2], (16, 1, 5, 5), jnp.float32) * (2.0 / 25) ** 0.5,
        b1=jax.random.normal(ks[3], (16,), jnp.float32) * 0.05,
        w2=jax.random.normal(ks[4], (32, 16, 5, 5), jnp.float32) * (2.0 / 400) ** 0.5,
        b2=jax.random.normal(ks[5], (32,), jnp.float32) * 0.05,
        wl=jax.random.normal(ks[6], (NUM_WEIGHTS, 32), jnp.float32) * (1.0 / 32) ** 0.5,
        bl=jax.random.normal(ks[7], (NUM_WEIGHTS,), jnp.float32) * 0.05,
        bn_gamma=jnp.ones((DIMS,), jnp.float32),
        bn_beta=jnp.zeros((DIMS,), jnp.float32),
    )


if __name__ == "__main__":
    key = jax.random.PRNGKey(0)
    kx, ks, kp = jax.random.split(key, 3)
    params = init_params(kp)
    x = jax.random.normal(kx, (N, INPUT_DIM, T, H, W), jnp.float32)
    std_x = jax.random.normal(ks, (N, 1, STD_HW, STD_HW), jnp.float32)

    out = forward_pallas(x, EPOCH, std_x, params)
    out = jax.block_until_ready(out)

    ref = _reference(x, EPOCH, std_x, params)
    np.testing.assert_allclose(np.asarray(out), np.asarray(ref), rtol=5e-2, atol=5e-2)
    print("KERNEL_OK")
</pallas_src>

<mosaic_0001>
module attributes {stable_mosaic.version = 11 : i64} {
  func.func @_fused_dynconv_bn_relu_kernel(%arg0: memref<2x4xf32, #tpu.memory_space<smem>>, %arg1: memref<8x658xf32, #tpu.memory_space<vmem>>, %arg2: memref<4x16x224xf32, #tpu.memory_space<vmem>>, %arg3: memref<6x8x1xf32, #tpu.memory_space<vmem>>, %arg4: memref<16x512xf32, #tpu.memory_space<vmem>>, %arg5: memref<224x512xbf16, #tpu.memory_space<vmem>>) attributes {dimension_semantics = [], scalar_prefetch = 0 : i64, scratch_operands = 1 : i64, tpu.core_type = #tpu.core_type<tc>} {
    %0 = tpu.iota {dimensions = array<i32: 1>} : vector<1x512xi32>
    %c6_i32 = arith.constant 6 : i32
    %1 = vector.broadcast %c6_i32 : i32 to vector<1x512xi32>
    %2 = arith.shrsi %0, %1 : vector<1x512xi32>
    %c3_i32 = arith.constant 3 : i32
    %3 = vector.broadcast %c3_i32 : i32 to vector<1x512xi32>
    %4 = arith.shrsi %0, %3 : vector<1x512xi32>
    %c7_i32 = arith.constant 7 : i32
    %5 = vector.broadcast %c7_i32 : i32 to vector<1x512xi32>
    %6 = arith.andi %4, %5 : vector<1x512xi32>
    %c7_i32_0 = arith.constant 7 : i32
    %7 = vector.broadcast %c7_i32_0 : i32 to vector<1x512xi32>
    %8 = arith.andi %0, %7 : vector<1x512xi32>
    %c0 = arith.constant 0 : index
    %c0_1 = arith.constant 0 : index
    %9 = vector.load %arg1[%c0, %c0_1] : memref<8x658xf32, #tpu.memory_space<vmem>>, vector<8x512xf32>
    %c1_i32 = arith.constant 1 : i32
    %10 = vector.broadcast %c1_i32 : i32 to vector<1x512xi32>
    %11 = arith.cmpi sge, %2, %10 : vector<1x512xi32>
    %c1_i32_2 = arith.constant 1 : i32
    %12 = vector.broadcast %c1_i32_2 : i32 to vector<1x512xi32>
    %13 = arith.cmpi sge, %6, %12 : vector<1x512xi32>
    %14 = arith.andi %11, %13 : vector<1x512xi1>
    %c1_i32_3 = arith.constant 1 : i32
    %15 = vector.broadcast %c1_i32_3 : i32 to vector<1x512xi32>
    %16 = arith.cmpi sge, %8, %15 : vector<1x512xi32>
    %17 = arith.andi %14, %16 : vector<1x512xi1>
    %cst = arith.constant 0.000000e+00 : f32
    %18 = vector.shape_cast %17 : vector<1x512xi1> to vector<1x512xi1>
    %19 = vector.broadcast %18 : vector<1x512xi1> to vector<8x512xi1>
    %20 = vector.broadcast %cst : f32 to vector<8x512xf32>
    %21 = arith.select %19, %9, %20 : vector<8x512xi1>, vector<8x512xf32>
    %c0_4 = arith.constant 0 : index
    %c1 = arith.constant 1 : index
    %22 = vector.load %arg1[%c0_4, %c1] : memref<8x658xf32, #tpu.memory_space<vmem>>, vector<8x512xf32>
    %c1_i32_5 = arith.constant 1 : i32
    %23 = vector.broadcast %c1_i32_5 : i32 to vector<1x512xi32>
    %24 = arith.cmpi sge, %2, %23 : vector<1x512xi32>
    %c1_i32_6 = arith.constant 1 : i32
    %25 = vector.broadcast %c1_i32_6 : i32 to vector<1x512xi32>
    %26 = arith.cmpi sge, %6, %25 : vector<1x512xi32>
    %27 = arith.andi %24, %26 : vector<1x512xi1>
    %cst_7 = arith.constant 0.000000e+00 : f32
    %28 = vector.shape_cast %27 : vector<1x512xi1> to vector<1x512xi1>
    %29 = vector.broadcast %28 : vector<1x512xi1> to vector<8x512xi1>
    %30 = vector.broadcast %cst_7 : f32 to vector<8x512xf32>
    %31 = arith.select %29, %22, %30 : vector<8x512xi1>, vector<8x512xf32>
    %32 = tpu.concatenate %21, %31 in 0 : vector<8x512xf32>, vector<8x512xf32> -> vector<16x512xf32>
    %33 = arith.truncf %32 : vector<16x512xf32> to vector<16x512xbf16>
    %c0_8 = arith.constant 0 : index
    %c0_9 = arith.constant 0 : index
    %34 = vector.load %arg5[%c0_8, %c0_9] : memref<224x512xbf16, #tpu.memory_space<vmem>>, vector<16x512xbf16>
    tpu.vector_store %arg5[%c0_8, %c0_9], %33 {strides = array<i32>} : memref<224x512xbf16, #tpu.memory_space<vmem>>, vector<16x512xbf16>,
    %c0_10 = arith.constant 0 : index
    %c2 = arith.constant 2 : index
    %35 = vector.load %arg1[%c0_10, %c2] : memref<8x658xf32, #tpu.memory_space<vmem>>, vector<8x512xf32>
    %c1_i32_11 = arith.constant 1 : i32
    %36 = vector.broadcast %c1_i32_11 : i32 to vector<1x512xi32>
    %37 = arith.cmpi sge, %2, %36 : vector<1x512xi32>
    %c1_i32_12 = arith.constant 1 : i32
    %38 = vector.broadcast %c1_i32_12 : i32 to vector<1x512xi32>
    %39 = arith.cmpi sge, %6, %38 : vector<1x512xi32>
    %40 = arith.andi %37, %39 : vector<1x512xi1>
    %c7_i32_13 = arith.constant 7 : i32
    %41 = vector.broadcast %c7_i32_13 : i32 to vector<1x512xi32>
    %42 = arith.cmpi slt, %8, %41 : vector<1x512xi32>
    %43 = arith.andi %40, %42 : vector<1x512xi1>
    %cst_14 = arith.constant 0.000000e+00 : f32
    %44 = vector.shape_cast %43 : vector<1x512xi1> to vector<1x512xi1>
    %45 = vector.broadcast %44 : vector<1x512xi1> to vector<8x512xi1>
    %46 = vector.broadcast %cst_14 : f32 to vector<8x512xf32>
    %47 = arith.select %45, %35, %46 : vector<8x512xi1>, vector<8x512xf32>
    %c0_15 = arith.constant 0 : index
    %c8 = arith.constant 8 : index
    %48 = vector.load %arg1[%c0_15, %c8] : memref<8x658xf32, #tpu.memory_space<vmem>>, vector<8x512xf32>
    %c1_i32_16 = arith.constant 1 : i32
    %49 = vector.broadcast %c1_i32_16 : i32 to vector<1x512xi32>
    %50 = arith.cmpi sge, %2, %49 : vector<1x512xi32>
    %c1_i32_17 = arith.constant 1 : i32
    %51 = vector.broadcast %c1_i32_17 : i32 to vector<1x512xi32>
    %52 = arith.cmpi sge, %8, %51 : vector<1x512xi32>
    %53 = arith.andi %50, %52 : vector<1x512xi1>
    %cst_18 = arith.constant 0.000000e+00 : f32
    %54 = vector.shape_cast %53 : vector<1x512xi1> to vector<1x512xi1>
    %55 = vector.broadcast %54 : vector<1x512xi1> to vector<8x512xi1>
    %56 = vector.broadcast %cst_18 : f32 to vector<8x512xf32>
    %57 = arith.select %55, %48, %56 : vector<8x512xi1>, vector<8x512xf32>
    %58 = tpu.concatenate %47, %57 in 0 : vector<8x512xf32>, vector<8x512xf32> -> vector<16x512xf32>
    %59 = arith.truncf %58 : vector<16x512xf32> to vector<16x512xbf16>
    %c16 = arith.constant 16 : index
    %c0_19 = arith.constant 0 : index
    %60 = vector.load %arg5[%c16, %c0_19] : memref<224x512xbf16, #tpu.memory_space<vmem>>, vector<16x512xbf16>
    tpu.vector_store %arg5[%c16, %c0_19], %59 {strides = array<i32>} : memref<224x512xbf16, #tpu.memory_space<vmem>>, vector<16x512xbf16>,
    %c0_20 = arith.constant 0 : index
    %c9 = arith.constant 9 : index
    %61 = vector.load %arg1[%c0_20, %c9] : memref<8x658xf32, #tpu.memory_space<vmem>>, vector<8x512xf32>
    %c1_i32_21 = arith.constant 1 : i32
    %62 = vector.broadcast %c1_i32_21 : i32 to vector<1x512xi32>
    %63 = arith.cmpi sge, %2, %62 : vector<1x512xi32>
    %cst_22 = arith.constant 0.000000e+00 : f32
    %64 = vector.shape_cast %63 : vector<1x512xi1> to vector<1x512xi1>
    %65 = vector.broadcast %64 : vector<1x512xi1> to vector<8x512xi1>
    %66 = vector.broadcast %cst_22 : f32 to vector<8x512xf32>
    %67 = arith.select %65, %61, %66 : vector<8x512xi1>, vector<8x512xf32>
    %c0_23 = arith.constant 0 : index
    %c10 = arith.constant 10 : index
    %68 = vector.load %arg1[%c0_23, %c10] : memref<8x658xf32, #tpu.memory_space<vmem>>, vector<8x512xf32>
    %c1_i32_24 = arith.constant 1 : i32
    %69 = vector.broadcast %c1_i32_24 : i32 to vector<1x512xi32>
    %70 = arith.cmpi sge, %2, %69 : vector<1x512xi32>
    %c7_i32_25 = arith.constant 7 : i32
    %71 = vector.broadcast %c7_i32_25 : i32 to vector<1x512xi32>
    %72 = arith.cmpi slt, %8, %71 : vector<1x512xi32>
    %73 = arith.andi %70, %72 : vector<1x512xi1>
    %cst_26 = arith.constant 0.000000e+00 : f32
    %74 = vector.shape_cast %73 : vector<1x512xi1> to vector<1x512xi1>
    %75 = vector.broadcast %74 : vector<1x512xi1> to vector<8x512xi1>
    %76 = vector.broadcast %cst_26 : f32 to vector<8x512xf32>
    %77 = arith.select %75, %68, %76 : vector<8x512xi1>, vector<8x512xf32>
    %78 = tpu.concatenate %67, %77 in 0 : vector<8x512xf32>, vector<8x512xf32> -> vector<16x512xf32>
    %79 = arith.truncf %78 : vector<16x512xf32> to vector<16x512xbf16>
    %c32 = arith.constant 32 : index
    %c0_27 = arith.constant 0 : index
    %80 = vector.load %arg5[%c32, %c0_27] : memref<224x512xbf16, #tpu.memory_space<vmem>>, vector<16x512xbf16>
    tpu.vector_store %arg5[%c32, %c0_27], %79 {strides = array<i32>} : memref<224x512xbf16, #tpu.memory_space<vmem>>, vector<16x512xbf16>,
    %c0_28 = arith.constant 0 : index
    %c16_29 = arith.constant 16 : index
    %81 = vector.load %arg1[%c0_28, %c16_29] : memref<8x658xf32, #tpu.memory_space<vmem>>, vector<8x512xf32>
    %c1_i32_30 = arith.constant 1 : i32
    %82 = vector.broadcast %c1_i32_30 : i32 to vector<1x512xi32>
    %83 = arith.cmpi sge, %2, %82 : vector<1x512xi32>
    %c7_i32_31 = arith.constant 7 : i32
    %84 = vector.broadcast %c7_i32_31 : i32 to vector<1x512xi32>
    %85 = arith.cmpi slt, %6, %84 : vector<1x512xi32>
    %86 = arith.andi %83, %85 : vector<1x512xi1>
    %c1_i32_32 = arith.constant 1 : i32
    %87 = vector.broadcast %c1_i32_32 : i32 to vector<1x512xi32>
    %88 = arith.cmpi sge, %8, %87 : vector<1x512xi32>
    %89 = arith.andi %86, %88 : vector<1x512xi1>
    %cst_33 = arith.constant 0.000000e+00 : f32
    %90 = vector.shape_cast %89 : vector<1x512xi1> to vector<1x512xi1>
    %91 = vector.broadcast %90 : vector<1x512xi1> to vector<8x512xi1>
    %92 = vector.broadcast %cst_33 : f32 to vector<8x512xf32>
    %93 = arith.select %91, %81, %92 : vector<8x512xi1>, vector<8x512xf32>
    %c0_34 = arith.constant 0 : index
    %c17 = arith.constant 17 : index
    %94 = vector.load %arg1[%c0_34, %c17] : memref<8x658xf32, #tpu.memory_space<vmem>>, vector<8x512xf32>
    %c1_i32_35 = arith.constant 1 : i32
    %95 = vector.broadcast %c1_i32_35 : i32 to vector<1x512xi32>
    %96 = arith.cmpi sge, %2, %95 : vector<1x512xi32>
    %c7_i32_36 = arith.constant 7 : i32
    %97 = vector.broadcast %c7_i32_36 : i32 to vector<1x512xi32>
    %98 = arith.cmpi slt, %6, %97 : vector<1x512xi32>
    %99 = arith.andi %96, %98 : vector<1x512xi1>
    %cst_37 = arith.constant 0.000000e+00 : f32
    %100 = vector.shape_cast %99 : vector<1x512xi1> to vector<1x512xi1>
    %101 = vector.broadcast %100 : vector<1x512xi1> to vector<8x512xi1>
    %102 = vector.broadcast %cst_37 : f32 to vector<8x512xf32>
    %103 = arith.select %101, %94, %102 : vector<8x512xi1>, vector<8x512xf32>
    %104 = tpu.concatenate %93, %103 in 0 : vector<8x512xf32>, vector<8x512xf32> -> vector<16x512xf32>
    %105 = arith.truncf %104 : vector<16x512xf32> to vector<16x512xbf16>
    %c48 = arith.constant 48 : index
    %c0_38 = arith.constant 0 : index
    %106 = vector.load %arg5[%c48, %c0_38] : memref<224x512xbf16, #tpu.memory_space<vmem>>, vector<16x512xbf16>
    tpu.vector_store %arg5[%c48, %c0_38], %105 {strides = array<i32>} : memref<224x512xbf16, #tpu.memory_space<vmem>>, vector<16x512xbf16>,
    %c0_39 = arith.constant 0 : index
    %c18 = arith.constant 18 : index
    %107 = vector.load %arg1[%c0_39, %c18] : memref<8x658xf32, #tpu.memory_space<vmem>>, vector<8x512xf32>
    %c1_i32_40 = arith.constant 1 : i32
    %108 = vector.broadcast %c1_i32_40 : i32 to vector<1x512xi32>
    %109 = arith.cmpi sge, %2, %108 : vector<1x512xi32>
    %c7_i32_41 = arith.constant 7 : i32
    %110 = vector.broadcast %c7_i32_41 : i32 to vector<1x512xi32>
    %111 = arith.cmpi slt, %6, %110 : vector<1x512xi32>
    %112 = arith.andi %109, %111 : vector<1x512xi1>
    %c7_i32_42 = arith.constant 7 : i32
    %113 = vector.broadcast %c7_i32_42 : i32 to vector<1x512xi32>
    %114 = arith.cmpi slt, %8, %113 : vector<1x512xi32>
    %115 = arith.andi %112, %114 : vector<1x512xi1>
    %cst_43 = arith.constant 0.000000e+00 : f32
    %116 = vector.shape_cast %115 : vector<1x512xi1> to vector<1x512xi1>
    %117 = vector.broadcast %116 : vector<1x512xi1> to vector<8x512xi1>
    %118 = vector.broadcast %cst_43 : f32 to vector<8x512xf32>
    %119 = arith.select %117, %107, %118 : vector<8x512xi1>, vector<8x512xf32>
    %c0_44 = arith.constant 0 : index
    %c64 = arith.constant 64 : index
    %120 = vector.load %arg1[%c0_44, %c64] : memref<8x658xf32, #tpu.memory_space<vmem>>, vector<8x512xf32>
    %c1_i32_45 = arith.constant 1 : i32
    %121 = vector.broadcast %c1_i32_45 : i32 to vector<1x512xi32>
    %122 = arith.cmpi sge, %6, %121 : vector<1x512xi32>
    %c1_i32_46 = arith.constant 1 : i32
    %123 = vector.broadcast %c1_i32_46 : i32 to vector<1x512xi32>
    %124 = arith.cmpi sge, %8, %123 : vector<1x512xi32>
    %125 = arith.andi %122, %124 : vector<1x512xi1>
    %cst_47 = arith.constant 0.000000e+00 : f32
    %126 = vector.shape_cast %125 : vector<1x512xi1> to vector<1x512xi1>
    %127 = vector.broadcast %126 : vector<1x512xi1> to vector<8x512xi1>
    %128 = vector.broadcast %cst_47 : f32 to vector<8x512xf32>
    %129 = arith.select %127, %120, %128 : vector<8x512xi1>, vector<8x512xf32>
    %130 = tpu.concatenate %119, %129 in 0 : vector<8x512xf32>, vector<8x512xf32> -> vector<16x512xf32>
    %131 = arith.truncf %130 : vector<16x512xf32> to vector<16x512xbf16>
    %c64_48 = arith.constant 64 : index
    %c0_49 = arith.constant 0 : index
    %132 = vector.load %arg5[%c64_48, %c0_49] : memref<224x512xbf16, #tpu.memory_space<vmem>>, vector<16x512xbf16>
    tpu.vector_store %arg5[%c64_48, %c0_49], %131 {strides = array<i32>} : memref<224x512xbf16, #tpu.memory_space<vmem>>, vector<16x512xbf16>,
    %c0_50 = arith.constant 0 : index
    %c65 = arith.constant 65 : index
    %133 = vector.load %arg1[%c0_50, %c65] : memref<8x658xf32, #tpu.memory_space<vmem>>, vector<8x512xf32>
    %c1_i32_51 = arith.constant 1 : i32
    %134 = vector.broadcast %c1_i32_51 : i32 to vector<1x512xi32>
    %135 = arith.cmpi sge, %6, %134 : vector<1x512xi32>
    %cst_52 = arith.constant 0.000000e+00 : f32
    %136 = vector.shape_cast %135 : vector<1x512xi1> to vector<1x512xi1>
    %137 = vector.broadcast %136 : vector<1x512xi1> to vector<8x512xi1>
    %138 = vector.broadcast %cst_52 : f32 to vector<8x512xf32>
    %139 = arith.select %137, %133, %138 : vector<8x512xi1>, vector<8x512xf32>
    %c0_53 = arith.constant 0 : index
    %c66 = arith.constant 66 : index
    %140 = vector.load %arg1[%c0_53, %c66] : memref<8x658xf32, #tpu.memory_space<vmem>>, vector<8x512xf32>
    %c1_i32_54 = arith.constant 1 : i32
    %141 = vector.broadcast %c1_i32_54 : i32 to vector<1x512xi32>
    %142 = arith.cmpi sge, %6, %141 : vector<1x512xi32>
    %c7_i32_55 = arith.constant 7 : i32
    %143 = vector.broadcast %c7_i32_55 : i32 to vector<1x512xi32>
    %144 = arith.cmpi slt, %8, %143 : vector<1x512xi32>
    %145 = arith.andi %142, %144 : vector<1x512xi1>
    %cst_56 = arith.constant 0.000000e+00 : f32
    %146 = vector.shape_cast %145 : vector<1x512xi1> to vector<1x512xi1>
    %147 = vector.broadcast %146 : vector<1x512xi1> to vector<8x512xi1>
    %148 = vector.broadcast %cst_56 : f32 to vector<8x512xf32>
    %149 = arith.select %147, %140, %148 : vector<8x512xi1>, vector<8x512xf32>
    %150 = tpu.concatenate %139, %149 in 0 : vector<8x512xf32>, vector<8x512xf32> -> vector<16x512xf32>
    %151 = arith.truncf %150 : vector<16x512xf32> to vector<16x512xbf16>
    %c80 = arith.constant 80 : index
    %c0_57 = arith.constant 0 : index
    %152 = vector.load %arg5[%c80, %c0_57] : memref<224x512xbf16, #tpu.memory_space<vmem>>, vector<16x512xbf16>
    tpu.vector_store %arg5[%c80, %c0_57], %151 {strides = array<i32>} : memref<224x512xbf16, #tpu.memory_space<vmem>>, vector<16x512xbf16>,
    %c0_58 = arith.constant 0 : index
    %c72 = arith.constant 72 : index
    %153 = vector.load %arg1[%c0_58, %c72] : memref<8x658xf32, #tpu.memory_space<vmem>>, vector<8x512xf32>
    %c1_i32_59 = arith.constant 1 : i32
    %154 = vector.broadcast %c1_i32_59 : i32 to vector<1x512xi32>
    %155 = arith.cmpi sge, %8, %154 : vector<1x512xi32>
    %cst_60 = arith.constant 0.000000e+00 : f32
    %156 = vector.shape_cast %155 : vector<1x512xi1> to vector<1x512xi1>
    %157 = vector.broadcast %156 : vector<1x512xi1> to vector<8x512xi1>
    %158 = vector.broadcast %cst_60 : f32 to vector<8x512xf32>
    %159 = arith.select %157, %153, %158 : vector<8x512xi1>, vector<8x512xf32>
    %c0_61 = arith.constant 0 : index
    %c73 = arith.constant 73 : index
    %160 = vector.load %arg1[%c0_61, %c73] : memref<8x658xf32, #tpu.memory_space<vmem>>, vector<8x512xf32>
    %161 = tpu.concatenate %159, %160 in 0 : vector<8x512xf32>, vector<8x512xf32> -> vector<16x512xf32>
    %162 = arith.truncf %161 : vector<16x512xf32> to vector<16x512xbf16>
    %c96 = arith.constant 96 : index
    %c0_62 = arith.constant 0 : index
    %163 = vector.load %arg5[%c96, %c0_62] : memref<224x512xbf16, #tpu.memory_space<vmem>>, vector<16x512xbf16>
    tpu.vector_store %arg5[%c96, %c0_62], %162 {strides = array<i32>} : memref<224x512xbf16, #tpu.memory_space<vmem>>, vector<16x512xbf16>,
    %c0_63 = arith.constant 0 : index
    %c74 = arith.constant 74 : index
    %164 = vector.load %arg1[%c0_63, %c74] : memref<8x658xf32, #tpu.memory_space<vmem>>, vector<8x512xf32>
    %c7_i32_64 = arith.constant 7 : i32
    %165 = vector.broadcast %c7_i32_64 : i32 to vector<1x512xi32>
    %166 = arith.cmpi slt, %8, %165 : vector<1x512xi32>
    %cst_65 = arith.constant 0.000000e+00 : f32
    %167 = vector.shape_cast %166 : vector<1x512xi1> to vector<1x512xi1>
    %168 = vector.broadcast %167 : vector<1x512xi1> to vector<8x512xi1>
    %169 = vector.broadcast %cst_65 : f32 to vector<8x512xf32>
    %170 = arith.select %168, %164, %169 : vector<8x512xi1>, vector<8x512xf32>
    %c0_66 = arith.constant 0 : index
    %c80_67 = arith.constant 80 : index
    %171 = vector.load %arg1[%c0_66, %c80_67] : memref<8x658xf32, #tpu.memory_space<vmem>>, vector<8x512xf32>
    %c7_i32_68 = arith.constant 7 : i32
    %172 = vector.broadcast %c7_i32_68 : i32 to vector<1x512xi32>
    %173 = arith.cmpi slt, %6, %172 : vector<1x512xi32>
    %c1_i32_69 = arith.constant 1 : i32
    %174 = vector.broadcast %c1_i32_69 : i32 to vector<1x512xi32>
    %175 = arith.cmpi sge, %8, %174 : vector<1x512xi32>
    %176 = arith.andi %173, %175 : vector<1x512xi1>
    %cst_70 = arith.constant 0.000000e+00 : f32
    %177 = vector.shape_cast %176 : vector<1x512xi1> to vector<1x512xi1>
    %178 = vector.broadcast %177 : vector<1x512xi1> to vector<8x512xi1>
    %179 = vector.broadcast %cst_70 : f32 to vector<8x512xf32>
    %180 = arith.select %178, %171, %179 : vector<8x512xi1>, vector<8x512xf32>
    %181 = tpu.concatenate %170, %180 in 0 : vector<8x512xf32>, vector<8x512xf32> -> vector<16x512xf32>
    %182 = arith.truncf %181 : vector<16x512xf32> to vector<16x512xbf16>
    %c112 = arith.constant 112 : index
    %c0_71 = arith.constant 0 : index
    %183 = vector.load %arg5[%c112, %c0_71] : memref<224x512xbf16, #tpu.memory_space<vmem>>, vector<16x512xbf16>
    tpu.vector_store %arg5[%c112, %c0_71], %182 {strides = array<i32>} : memref<224x512xbf16, #tpu.memory_space<vmem>>, vector<16x512xbf16>,
    %c0_72 = arith.constant 0 : index
    %c81 = arith.constant 81 : index
    %184 = vector.load %arg1[%c0_72, %c81] : memref<8x658xf32, #tpu.memory_space<vmem>>, vector<8x512xf32>
    %c7_i32_73 = arith.constant 7 : i32
    %185 = vector.broadcast %c7_i32_73 : i32 to vector<1x512xi32>
    %186 = arith.cmpi slt, %6, %185 : vector<1x512xi32>
    %cst_74 = arith.constant 0.000000e+00 : f32
    %187 = vector.shape_cast %186 : vector<1x512xi1> to vector<1x512xi1>
    %188 = vector.broadcast %187 : vector<1x512xi1> to vector<8x512xi1>
    %189 = vector.broadcast %cst_74 : f32 to vector<8x512xf32>
    %190 = arith.select %188, %184, %189 : vector<8x512xi1>, vector<8x512xf32>
    %c0_75 = arith.constant 0 : index
    %c82 = arith.constant 82 : index
    %191 = vector.load %arg1[%c0_75, %c82] : memref<8x658xf32, #tpu.memory_space<vmem>>, vector<8x512xf32>
    %c7_i32_76 = arith.constant 7 : i32
    %192 = vector.broadcast %c7_i32_76 : i32 to vector<1x512xi32>
    %193 = arith.cmpi slt, %6, %192 : vector<1x512xi32>
    %c7_i32_77 = arith.constant 7 : i32
    %194 = vector.broadcast %c7_i32_77 : i32 to vector<1x512xi32>
    %195 = arith.cmpi slt, %8, %194 : vector<1x512xi32>
    %196 = arith.andi %193, %195 : vector<1x512xi1>
    %cst_78 = arith.constant 0.000000e+00 : f32
    %197 = vector.shape_cast %196 : vector<1x512xi1> to vector<1x512xi1>
    %198 = vector.broadcast %197 : vector<1x512xi1> to vector<8x512xi1>
    %199 = vector.broadcast %cst_78 : f32 to vector<8x512xf32>
    %200 = arith.select %198, %191, %199 : vector<8x512xi1>, vector<8x512xf32>
    %201 = tpu.concatenate %190, %200 in 0 : vector<8x512xf32>, vector<8x512xf32> -> vector<16x512xf32>
    %202 = arith.truncf %201 : vector<16x512xf32> to vector<16x512xbf16>
    %c128 = arith.constant 128 : index
    %c0_79 = arith.constant 0 : index
    %203 = vector.load %arg5[%c128, %c0_79] : memref<224x512xbf16, #tpu.memory_space<vmem>>, vector<16x512xbf16>
    tpu.vector_store %arg5[%c128, %c0_79], %202 {strides = array<i32>} : memref<224x512xbf16, #tpu.memory_space<vmem>>, vector<16x512xbf16>,
    %c0_80 = arith.constant 0 : index
    %c128_81 = arith.constant 128 : index
    %204 = vector.load %arg1[%c0_80, %c128_81] : memref<8x658xf32, #tpu.memory_space<vmem>>, vector<8x512xf32>
    %c7_i32_82 = arith.constant 7 : i32
    %205 = vector.broadcast %c7_i32_82 : i32 to vector<1x512xi32>
    %206 = arith.cmpi slt, %2, %205 : vector<1x512xi32>
    %c1_i32_83 = arith.constant 1 : i32
    %207 = vector.broadcast %c1_i32_83 : i32 to vector<1x512xi32>
    %208 = arith.cmpi sge, %6, %207 : vector<1x512xi32>
    %209 = arith.andi %206, %208 : vector<1x512xi1>
    %c1_i32_84 = arith.constant 1 : i32
    %210 = vector.broadcast %c1_i32_84 : i32 to vector<1x512xi32>
    %211 = arith.cmpi sge, %8, %210 : vector<1x512xi32>
    %212 = arith.andi %209, %211 : vector<1x512xi1>
    %cst_85 = arith.constant 0.000000e+00 : f32
    %213 = vector.shape_cast %212 : vector<1x512xi1> to vector<1x512xi1>
    %214 = vector.broadcast %213 : vector<1x512xi1> to vector<8x512xi1>
    %215 = vector.broadcast %cst_85 : f32 to vector<8x512xf32>
    %216 = arith.select %214, %204, %215 : vector<8x512xi1>, vector<8x512xf32>
    %c0_86 = arith.constant 0 : index
    %c129 = arith.constant 129 : index
    %217 = vector.load %arg1[%c0_86, %c129] : memref<8x658xf32, #tpu.memory_space<vmem>>, vector<8x512xf32>
    %c7_i32_87 = arith.constant 7 : i32
    %218 = vector.broadcast %c7_i32_87 : i32 to vector<1x512xi32>
    %219 = arith.cmpi slt, %2, %218 : vector<1x512xi32>
    %c1_i32_88 = arith.constant 1 : i32
    %220 = vector.broadcast %c1_i32_88 : i32 to vector<1x512xi32>
    %221 = arith.cmpi sge, %6, %220 : vector<1x512xi32>
    %222 = arith.andi %219, %221 : vector<1x512xi1>
    %cst_89 = arith.constant 0.000000e+00 : f32
    %223 = vector.shape_cast %222 : vector<1x512xi1> to vector<1x512xi1>
    %224 = vector.broadcast %223 : vector<1x512xi1> to vector<8x512xi1>
    %225 = vector.broadcast %cst_89 : f32 to vector<8x512xf32>
    %226 = arith.select %224, %217, %225 : vector<8x512xi1>, vector<8x512xf32>
    %227 = tpu.concatenate %216, %226 in 0 : vector<8x512xf32>, vector<8x512xf32> -> vector<16x512xf32>
    %228 = arith.truncf %227 : vector<16x512xf32> to vector<16x512xbf16>
    %c144 = arith.constant 144 : index
    %c0_90 = arith.constant 0 : index
    %229 = vector.load %arg5[%c144, %c0_90] : memref<224x512xbf16, #tpu.memory_space<vmem>>, vector<16x512xbf16>
    tpu.vector_store %arg5[%c144, %c0_90], %228 {strides = array<i32>} : memref<224x512xbf16, #tpu.memory_space<vmem>>, vector<16x512xbf16>,
    %c0_91 = arith.constant 0 : index
    %c130 = arith.constant 130 : index
    %230 = vector.load %arg1[%c0_91, %c130] : memref<8x658xf32, #tpu.memory_space<vmem>>, vector<8x512xf32>
    %c7_i32_92 = arith.constant 7 : i32
    %231 = vector.broadcast %c7_i32_92 : i32 to vector<1x512xi32>
    %232 = arith.cmpi slt, %2, %231 : vector<1x512xi32>
    %c1_i32_93 = arith.constant 1 : i32
    %233 = vector.broadcast %c1_i32_93 : i32 to vector<1x512xi32>
    %234 = arith.cmpi sge, %6, %233 : vector<1x512xi32>
    %235 = arith.andi %232, %234 : vector<1x512xi1>
    %c7_i32_94 = arith.constant 7 : i32
    %236 = vector.broadcast %c7_i32_94 : i32 to vector<1x512xi32>
    %237 = arith.cmpi slt, %8, %236 : vector<1x512xi32>
    %238 = arith.andi %235, %237 : vector<1x512xi1>
    %cst_95 = arith.constant 0.000000e+00 : f32
    %239 = vector.shape_cast %238 : vector<1x512xi1> to vector<1x512xi1>
    %240 = vector.broadcast %239 : vector<1x512xi1> to vector<8x512xi1>
    %241 = vector.broadcast %cst_95 : f32 to vector<8x512xf32>
    %242 = arith.select %240, %230, %241 : vector<8x512xi1>, vector<8x512xf32>
    %c0_96 = arith.constant 0 : index
    %c136 = arith.constant 136 : index
    %243 = vector.load %arg1[%c0_96, %c136] : memref<8x658xf32, #tpu.memory_space<vmem>>, vector<8x512xf32>
    %c7_i32_97 = arith.constant 7 : i32
    %244 = vector.broadcast %c7_i32_97 : i32 to vector<1x512xi32>
    %245 = arith.cmpi slt, %2, %244 : vector<1x512xi32>
    %c1_i32_98 = arith.constant 1 : i32
    %246 = vector.broadcast %c1_i32_98 : i32 to vector<1x512xi32>
    %247 = arith.cmpi sge, %8, %246 : vector<1x512xi32>
    %248 = arith.andi %245, %247 : vector<1x512xi1>
    %cst_99 = arith.constant 0.000000e+00 : f32
    %249 = vector.shape_cast %248 : vector<1x512xi1> to vector<1x512xi1>
    %250 = vector.broadcast %249 : vector<1x512xi1> to vector<8x512xi1>
    %251 = vector.broadcast %cst_99 : f32 to vector<8x512xf32>
    %252 = arith.select %250, %243, %251 : vector<8x512xi1>, vector<8x512xf32>
    %253 = tpu.concatenate %242, %252 in 0 : vector<8x512xf32>, vector<8x512xf32> -> vector<16x512xf32>
    %254 = arith.truncf %253 : vector<16x512xf32> to vector<16x512xbf16>
    %c160 = arith.constant 160 : index
    %c0_100 = arith.constant 0 : index
    %255 = vector.load %arg5[%c160, %c0_100] : memref<224x512xbf16, #tpu.memory_space<vmem>>, vector<16x512xbf16>
    tpu.vector_store %arg5[%c160, %c0_100], %254 {strides = array<i32>} : memref<224x512xbf16, #tpu.memory_space<vmem>>, vector<16x512xbf16>,
    %c0_101 = arith.constant 0 : index
    %c137 = arith.constant 137 : index
    %256 = vector.load %arg1[%c0_101, %c137] : memref<8x658xf32, #tpu.memory_space<vmem>>, vector<8x512xf32>
    %c7_i32_102 = arith.constant 7 : i32
    %257 = vector.broadcast %c7_i32_102 : i32 to vector<1x512xi32>
    %258 = arith.cmpi slt, %2, %257 : vector<1x512xi32>
    %cst_103 = arith.constant 0.000000e+00 : f32
    %259 = vector.shape_cast %258 : vector<1x512xi1> to vector<1x512xi1>
    %260 = vector.broadcast %259 : vector<1x512xi1> to vector<8x512xi1>
    %261 = vector.broadcast %cst_103 : f32 to vector<8x512xf32>
    %262 = arith.select %260, %256, %261 : vector<8x512xi1>, vector<8x512xf32>
    %c0_104 = arith.constant 0 : index
    %c138 = arith.constant 138 : index
    %263 = vector.load %arg1[%c0_104, %c138] : memref<8x658xf32, #tpu.memory_space<vmem>>, vector<8x512xf32>
    %c7_i32_105 = arith.constant 7 : i32
    %264 = vector.broadcast %c7_i32_105 : i32 to vector<1x512xi32>
    %265 = arith.cmpi slt, %2, %264 : vector<1x512xi32>
    %c7_i32_106 = arith.constant 7 : i32
    %266 = vector.broadcast %c7_i32_106 : i32 to vector<1x512xi32>
    %267 = arith.cmpi slt, %8, %266 : vector<1x512xi32>
    %268 = arith.andi %265, %267 : vector<1x512xi1>
    %cst_107 = arith.constant 0.000000e+00 : f32
    %269 = vector.shape_cast %268 : vector<1x512xi1> to vector<1x512xi1>
    %270 = vector.broadcast %269 : vector<1x512xi1> to vector<8x512xi1>
    %271 = vector.broadcast %cst_107 : f32 to vector<8x512xf32>
    %272 = arith.select %270, %263, %271 : vector<8x512xi1>, vector<8x512xf32>
    %273 = tpu.concatenate %262, %272 in 0 : vector<8x512xf32>, vector<8x512xf32> -> vector<16x512xf32>
    %274 = arith.truncf %273 : vector<16x512xf32> to vector<16x512xbf16>
    %c176 = arith.constant 176 : index
    %c0_108 = arith.constant 0 : index
    %275 = vector.load %arg5[%c176, %c0_108] : memref<224x512xbf16, #tpu.memory_space<vmem>>, vector<16x512xbf16>
    tpu.vector_store %arg5[%c176, %c0_108], %274 {strides = array<i32>} : memref<224x512xbf16, #tpu.memory_space<vmem>>, vector<16x512xbf16>,
    %c0_109 = arith.constant 0 : index
    %c144_110 = arith.constant 144 : index
    %276 = vector.load %arg1[%c0_109, %c144_110] : memref<8x658xf32, #tpu.memory_space<vmem>>, vector<8x512xf32>
    %c7_i32_111 = arith.constant 7 : i32
    %277 = vector.broadcast %c7_i32_111 : i32 to vector<1x512xi32>
    %278 = arith.cmpi slt, %2, %277 : vector<1x512xi32>
    %c7_i32_112 = arith.constant 7 : i32
    %279 = vector.broadcast %c7_i32_112 : i32 to vector<1x512xi32>
    %280 = arith.cmpi slt, %6, %279 : vector<1x512xi32>
    %281 = arith.andi %278, %280 : vector<1x512xi1>
    %c1_i32_113 = arith.constant 1 : i32
    %282 = vector.broadcast %c1_i32_113 : i32 to vector<1x512xi32>
    %283 = arith.cmpi sge, %8, %282 : vector<1x512xi32>
    %284 = arith.andi %281, %283 : vector<1x512xi1>
    %cst_114 = arith.constant 0.000000e+00 : f32
    %285 = vector.shape_cast %284 : vector<1x512xi1> to vector<1x512xi1>
    %286 = vector.broadcast %285 : vector<1x512xi1> to vector<8x512xi1>
    %287 = vector.broadcast %cst_114 : f32 to vector<8x512xf32>
    %288 = arith.select %286, %276, %287 : vector<8x512xi1>, vector<8x512xf32>
    %c0_115 = arith.constant 0 : index
    %c145 = arith.constant 145 : index
    %289 = vector.load %arg1[%c0_115, %c145] : memref<8x658xf32, #tpu.memory_space<vmem>>, vector<8x512xf32>
    %c7_i32_116 = arith.constant 7 : i32
    %290 = vector.broadcast %c7_i32_116 : i32 to vector<1x512xi32>
    %291 = arith.cmpi slt, %2, %290 : vector<1x512xi32>
    %c7_i32_117 = arith.constant 7 : i32
    %292 = vector.broadcast %c7_i32_117 : i32 to vector<1x512xi32>
    %293 = arith.cmpi slt, %6, %292 : vector<1x512xi32>
    %294 = arith.andi %291, %293 : vector<1x512xi1>
    %cst_118 = arith.constant 0.000000e+00 : f32
    %295 = vector.shape_cast %294 : vector<1x512xi1> to vector<1x512xi1>
    %296 = vector.broadcast %295 : vector<1x512xi1> to vector<8x512xi1>
    %297 = vector.broadcast %cst_118 : f32 to vector<8x512xf32>
    %298 = arith.select %296, %289, %297 : vector<8x512xi1>, vector<8x512xf32>
    %299 = tpu.concatenate %288, %298 in 0 : vector<8x512xf32>, vector<8x512xf32> -> vector<16x512xf32>
    %300 = arith.truncf %299 : vector<16x512xf32> to vector<16x512xbf16>
    %c192 = arith.constant 192 : index
    %c0_119 = arith.constant 0 : index
    %301 = vector.load %arg5[%c192, %c0_119] : memref<224x512xbf16, #tpu.memory_space<vmem>>, vector<16x512xbf16>
    tpu.vector_store %arg5[%c192, %c0_119], %300 {strides = array<i32>} : memref<224x512xbf16, #tpu.memory_space<vmem>>, vector<16x512xbf16>,
    %c0_120 = arith.constant 0 : index
    %c146 = arith.constant 146 : index
    %302 = vector.load %arg1[%c0_120, %c146] : memref<8x658xf32, #tpu.memory_space<vmem>>, vector<8x512xf32>
    %c7_i32_121 = arith.constant 7 : i32
    %303 = vector.broadcast %c7_i32_121 : i32 to vector<1x512xi32>
    %304 = arith.cmpi slt, %2, %303 : vector<1x512xi32>
    %c7_i32_122 = arith.constant 7 : i32
    %305 = vector.broadcast %c7_i32_122 : i32 to vector<1x512xi32>
    %306 = arith.cmpi slt, %6, %305 : vector<1x512xi32>
    %307 = arith.andi %304, %306 : vector<1x512xi1>
    %c7_i32_123 = arith.constant 7 : i32
    %308 = vector.broadcast %c7_i32_123 : i32 to vector<1x512xi32>
    %309 = arith.cmpi slt, %8, %308 : vector<1x512xi32>
    %310 = arith.andi %307, %309 : vector<1x512xi1>
    %cst_124 = arith.constant 0.000000e+00 : f32
    %311 = vector.shape_cast %310 : vector<1x512xi1> to vector<1x512xi1>
    %312 = vector.broadcast %311 : vector<1x512xi1> to vector<8x512xi1>
    %313 = vector.broadcast %cst_124 : f32 to vector<8x512xf32>
    %314 = arith.select %312, %302, %313 : vector<8x512xi1>, vector<8x512xf32>
    %cst_125 = arith.constant 0.000000e+00 : f32
    %315 = vector.broadcast %cst_125 : f32 to vector<8x512xf32>
    %316 = tpu.concatenate %314, %315 in 0 : vector<8x512xf32>, vector<8x512xf32> -> vector<16x512xf32>
    %317 = arith.truncf %316 : vector<16x512xf32> to vector<16x512xbf16>
    %c208 = arith.constant 208 : index
    %c0_126 = arith.constant 0 : index
    %318 = vector.load %arg5[%c208, %c0_126] : memref<224x512xbf16, #tpu.memory_space<vmem>>, vector<16x512xbf16>
    tpu.vector_store %arg5[%c208, %c0_126], %317 {strides = array<i32>} : memref<224x512xbf16, #tpu.memory_space<vmem>>, vector<16x512xbf16>,
    %c0_127 = arith.constant 0 : index
    %c0_128 = arith.constant 0 : index
    %319 = memref.load %arg0[%c0_127, %c0_128] : memref<2x4xf32, #tpu.memory_space<smem>>
    %c0_129 = arith.constant 0 : index
    %c0_130 = arith.constant 0 : index
    %c0_131 = arith.constant 0 : index
    %320 = vector.load %arg2[%c0_129, %c0_130, %c0_131] : memref<4x16x224xf32, #tpu.memory_space<vmem>>, vector<1x8x224xf32>
    %321 = vector.shape_cast %320 : vector<1x8x224xf32> to vector<8x224xf32>
    %322 = vector.broadcast %319 : f32 to vector<8x224xf32>
    %323 = arith.mulf %322, %321 : vector<8x224xf32>
    %c0_132 = arith.constant 0 : index
    %c0_133 = arith.constant 0 : index
    %324 = memref.load %arg0[%c0_132, %c0_133] : memref<2x4xf32, #tpu.memory_space<smem>>
    %c0_134 = arith.constant 0 : index
    %c0_135 = arith.constant 0 : index
    %c0_136 = arith.constant 0 : index
    %325 = vector.load %arg3[%c0_134, %c0_135, %c0_136] : memref<6x8x1xf32, #tpu.memory_space<vmem>>, vector<1x8x1xf32>
    %326 = vector.shape_cast %325 : vector<1x8x1xf32> to vector<8x1xf32>
    %327 = vector.broadcast %324 : f32 to vector<8x1xf32>
    %328 = arith.mulf %327, %326 : vector<8x1xf32>
    %c0_137 = arith.constant 0 : index
    %c1_138 = arith.constant 1 : index
    %329 = memref.load %arg0[%c0_137, %c1_138] : memref<2x4xf32, #tpu.memory_space<smem>>
    %c1_139 = arith.constant 1 : index
    %c0_140 = arith.constant 0 : index
    %c0_141 = arith.constant 0 : index
    %330 = vector.load %arg2[%c1_139, %c0_140, %c0_141] : memref<4x16x224xf32, #tpu.memory_space<vmem>>, vector<1x8x224xf32>
    %331 = vector.shape_cast %330 : vector<1x8x224xf32> to vector<8x224xf32>
    %332 = vector.broadcast %329 : f32 to vector<8x224xf32>
    %333 = arith.mulf %332, %331 : vector<8x224xf32>
    %334 = arith.addf %323, %333 : vector<8x224xf32>
    %c0_142 = arith.constant 0 : index
    %c1_143 = arith.constant 1 : index
    %335 = memref.load %arg0[%c0_142, %c1_143] : memref<2x4xf32, #tpu.memory_space<smem>>
    %c1_144 = arith.constant 1 : index
    %c0_145 = arith.constant 0 : index
    %c0_146 = arith.constant 0 : index
    %336 = vector.load %arg3[%c1_144, %c0_145, %c0_146] : memref<6x8x1xf32, #tpu.memory_space<vmem>>, vector<1x8x1xf32>
    %337 = vector.shape_cast %336 : vector<1x8x1xf32> to vector<8x1xf32>
    %338 = vector.broadcast %335 : f32 to vector<8x1xf32>
    %339 = arith.mulf %338, %337 : vector<8x1xf32>
    %340 = arith.addf %328, %339 : vector<8x1xf32>
    %c0_147 = arith.constant 0 : index
    %c2_148 = arith.constant 2 : index
    %341 = memref.load %arg0[%c0_147, %c2_148] : memref<2x4xf32, #tpu.memory_space<smem>>
    %c2_149 = arith.constant 2 : index
    %c0_150 = arith.constant 0 : index
    %c0_151 = arith.constant 0 : index
    %342 = vector.load %arg2[%c2_149, %c0_150, %c0_151] : memref<4x16x224xf32, #tpu.memory_space<vmem>>, vector<1x8x224xf32>
    %343 = vector.shape_cast %342 : vector<1x8x224xf32> to vector<8x224xf32>
    %344 = vector.broadcast %341 : f32 to vector<8x224xf32>
    %345 = arith.mulf %344, %343 : vector<8x224xf32>
    %346 = arith.addf %334, %345 : vector<8x224xf32>
    %c0_152 = arith.constant 0 : index
    %c2_153 = arith.constant 2 : index
    %347 = memref.load %arg0[%c0_152, %c2_153] : memref<2x4xf32, #tpu.memory_space<smem>>
    %c2_154 = arith.constant 2 : index
    %c0_155 = arith.constant 0 : index
    %c0_156 = arith.constant 0 : index
    %348 = vector.load %arg3[%c2_154, %c0_155, %c0_156] : memref<6x8x1xf32, #tpu.memory_space<vmem>>, vector<1x8x1xf32>
    %349 = vector.shape_cast %348 : vector<1x8x1xf32> to vector<8x1xf32>
    %350 = vector.broadcast %347 : f32 to vector<8x1xf32>
    %351 = arith.mulf %350, %349 : vector<8x1xf32>
    %352 = arith.addf %340, %351 : vector<8x1xf32>
    %c0_157 = arith.constant 0 : index
    %c3 = arith.constant 3 : index
    %353 = memref.load %arg0[%c0_157, %c3] : memref<2x4xf32, #tpu.memory_space<smem>>
    %c3_158 = arith.constant 3 : index
    %c0_159 = arith.constant 0 : index
    %c0_160 = arith.constant 0 : index
    %354 = vector.load %arg2[%c3_158, %c0_159, %c0_160] : memref<4x16x224xf32, #tpu.memory_space<vmem>>, vector<1x8x224xf32>
    %355 = vector.shape_cast %354 : vector<1x8x224xf32> to vector<8x224xf32>
    %356 = vector.broadcast %353 : f32 to vector<8x224xf32>
    %357 = arith.mulf %356, %355 : vector<8x224xf32>
    %358 = arith.addf %346, %357 : vector<8x224xf32>
    %c0_161 = arith.constant 0 : index
    %c3_162 = arith.constant 3 : index
    %359 = memref.load %arg0[%c0_161, %c3_162] : memref<2x4xf32, #tpu.memory_space<smem>>
    %c3_163 = arith.constant 3 : index
    %c0_164 = arith.constant 0 : index
    %c0_165 = arith.constant 0 : index
    %360 = vector.load %arg3[%c3_163, %c0_164, %c0_165] : memref<6x8x1xf32, #tpu.memory_space<vmem>>, vector<1x8x1xf32>
    %361 = vector.shape_cast %360 : vector<1x8x1xf32> to vector<8x1xf32>
    %362 = vector.broadcast %359 : f32 to vector<8x1xf32>
    %363 = arith.mulf %362, %361 : vector<8x1xf32>
    %364 = arith.addf %352, %363 : vector<8x1xf32>
    %c1_166 = arith.constant 1 : index
    %c0_167 = arith.constant 0 : index
    %365 = memref.load %arg0[%c1_166, %c0_167] : memref<2x4xf32, #tpu.memory_space<smem>>
    %c0_168 = arith.constant 0 : index
    %c8_169 = arith.constant 8 : index
    %c0_170 = arith.constant 0 : index
    %366 = vector.load %arg2[%c0_168, %c8_169, %c0_170] : memref<4x16x224xf32, #tpu.memory_space<vmem>>, vector<1x8x224xf32>
    %367 = vector.shape_cast %366 : vector<1x8x224xf32> to vector<8x224xf32>
    %368 = vector.broadcast %365 : f32 to vector<8x224xf32>
    %369 = arith.mulf %368, %367 : vector<8x224xf32>
    %c1_171 = arith.constant 1 : index
    %c0_172 = arith.constant 0 : index
    %370 = memref.load %arg0[%c1_171, %c0_172] : memref<2x4xf32, #tpu.memory_space<smem>>
    %c0_173 = arith.constant 0 : index
    %c0_174 = arith.constant 0 : index
    %c0_175 = arith.constant 0 : index
    %371 = vector.load %arg3[%c0_173, %c0_174, %c0_175] : memref<6x8x1xf32, #tpu.memory_space<vmem>>, vector<1x8x1xf32>
    %372 = vector.shape_cast %371 : vector<1x8x1xf32> to vector<8x1xf32>
    %373 = vector.broadcast %370 : f32 to vector<8x1xf32>
    %374 = arith.mulf %373, %372 : vector<8x1xf32>
    %c1_176 = arith.constant 1 : index
    %c1_177 = arith.constant 1 : index
    %375 = memref.load %arg0[%c1_176, %c1_177] : memref<2x4xf32, #tpu.memory_space<smem>>
    %c1_178 = arith.constant 1 : index
    %c8_179 = arith.constant 8 : index
    %c0_180 = arith.constant 0 : index
    %376 = vector.load %arg2[%c1_178, %c8_179, %c0_180] : memref<4x16x224xf32, #tpu.memory_space<vmem>>, vector<1x8x224xf32>
    %377 = vector.shape_cast %376 : vector<1x8x224xf32> to vector<8x224xf32>
    %378 = vector.broadcast %375 : f32 to vector<8x224xf32>
    %379 = arith.mulf %378, %377 : vector<8x224xf32>
    %380 = arith.addf %369, %379 : vector<8x224xf32>
    %c1_181 = arith.constant 1 : index
    %c1_182 = arith.constant 1 : index
    %381 = memref.load %arg0[%c1_181, %c1_182] : memref<2x4xf32, #tpu.memory_space<smem>>
    %c1_183 = arith.constant 1 : index
    %c0_184 = arith.constant 0 : index
    %c0_185 = arith.constant 0 : index
    %382 = vector.load %arg3[%c1_183, %c0_184, %c0_185] : memref<6x8x1xf32, #tpu.memory_space<vmem>>, vector<1x8x1xf32>
    %383 = vector.shape_cast %382 : vector<1x8x1xf32> to vector<8x1xf32>
    %384 = vector.broadcast %381 : f32 to vector<8x1xf32>
    %385 = arith.mulf %384, %383 : vector<8x1xf32>
    %386 = arith.addf %374, %385 : vector<8x1xf32>
    %c1_186 = arith.constant 1 : index
    %c2_187 = arith.constant 2 : index
    %387 = memref.load %arg0[%c1_186, %c2_187] : memref<2x4xf32, #tpu.memory_space<smem>>
    %c2_188 = arith.constant 2 : index
    %c8_189 = arith.constant 8 : index
    %c0_190 = arith.constant 0 : index
    %388 = vector.load %arg2[%c2_188, %c8_189, %c0_190] : memref<4x16x224xf32, #tpu.memory_space<vmem>>, vector<1x8x224xf32>
    %389 = vector.shape_cast %388 : vector<1x8x224xf32> to vector<8x224xf32>
    %390 = vector.broadcast %387 : f32 to vector<8x224xf32>
    %391 = arith.mulf %390, %389 : vector<8x224xf32>
    %392 = arith.addf %380, %391 : vector<8x224xf32>
    %c1_191 = arith.constant 1 : index
    %c2_192 = arith.constant 2 : index
    %393 = memref.load %arg0[%c1_191, %c2_192] : memref<2x4xf32, #tpu.memory_space<smem>>
    %c2_193 = arith.constant 2 : index
    %c0_194 = arith.constant 0 : index
    %c0_195 = arith.constant 0 : index
    %394 = vector.load %arg3[%c2_193, %c0_194, %c0_195] : memref<6x8x1xf32, #tpu.memory_space<vmem>>, vector<1x8x1xf32>
    %395 = vector.shape_cast %394 : vector<1x8x1xf32> to vector<8x1xf32>
    %396 = vector.broadcast %393 : f32 to vector<8x1xf32>
    %397 = arith.mulf %396, %395 : vector<8x1xf32>
    %398 = arith.addf %386, %397 : vector<8x1xf32>
    %c1_196 = arith.constant 1 : index
    %c3_197 = arith.constant 3 : index
    %399 = memref.load %arg0[%c1_196, %c3_197] : memref<2x4xf32, #tpu.memory_space<smem>>
    %c3_198 = arith.constant 3 : index
    %c8_199 = arith.constant 8 : index
    %c0_200 = arith.constant 0 : index
    %400 = vector.load %arg2[%c3_198, %c8_199, %c0_200] : memref<4x16x224xf32, #tpu.memory_space<vmem>>, vector<1x8x224xf32>
    %401 = vector.shape_cast %400 : vector<1x8x224xf32> to vector<8x224xf32>
    %402 = vector.broadcast %399 : f32 to vector<8x224xf32>
    %403 = arith.mulf %402, %401 : vector<8x224xf32>
    %404 = arith.addf %392, %403 : vector<8x224xf32>
    %c1_201 = arith.constant 1 : index
    %c3_202 = arith.constant 3 : index
    %405 = memref.load %arg0[%c1_201, %c3_202] : memref<2x4xf32, #tpu.memory_space<smem>>
    %c3_203 = arith.constant 3 : index
    %c0_204 = arith.constant 0 : index
    %c0_205 = arith.constant 0 : index
    %406 = vector.load %arg3[%c3_203, %c0_204, %c0_205] : memref<6x8x1xf32, #tpu.memory_space<vmem>>, vector<1x8x1xf32>
    %407 = vector.shape_cast %406 : vector<1x8x1xf32> to vector<8x1xf32>
    %408 = vector.broadcast %405 : f32 to vector<8x1xf32>
    %409 = arith.mulf %408, %407 : vector<8x1xf32>
    %410 = arith.addf %398, %409 : vector<8x1xf32>
    %411 = tpu.concatenate %358, %404 in 0 : vector<8x224xf32>, vector<8x224xf32> -> vector<16x224xf32>
    %412 = arith.truncf %411 : vector<16x224xf32> to vector<16x224xbf16>
    %413 = tpu.concatenate %364, %410 in 0 : vector<8x1xf32>, vector<8x1xf32> -> vector<16x1xf32>
    %c0_206 = arith.constant 0 : index
    %c0_207 = arith.constant 0 : index
    %414 = vector.load %arg5[%c0_206, %c0_207] : memref<224x512xbf16, #tpu.memory_space<vmem>>, vector<224x512xbf16>
    %cst_208 = arith.constant dense<0.000000e+00> : vector<16x512xf32>
    %415 = tpu.matmul %412, %414, %cst_208 {dimension_numbers = #tpu.dot_dimension_numbers<[1], [0], [0], [1], [0, 0, 1, 1], [], []>} : vector<16x224xbf16>, vector<224x512xbf16>, vector<16x512xf32> -> vector<16x512xf32>
    %cst_209 = arith.constant dense<0.000000e+00> : vector<16xf32>
    %416 = vector.multi_reduction <add>, %415, %cst_209 [1] : vector<16x512xf32> to vector<16xf32>
    %417 = vector.shape_cast %416 : vector<16xf32> to vector<16x1xf32>
    %418 = arith.mulf %415, %415 : vector<16x512xf32>
    %cst_210 = arith.constant dense<0.000000e+00> : vector<16xf32>
    %419 = vector.multi_reduction <add>, %418, %cst_210 [1] : vector<16x512xf32> to vector<16xf32>
    %420 = vector.shape_cast %419 : vector<16xf32> to vector<16x1xf32>
    %cst_211 = arith.constant 5.120000e+02 : f32
    %421 = vector.broadcast %cst_211 : f32 to vector<16x1xf32>
    %422 = arith.mulf %421, %413 : vector<16x1xf32>
    %423 = arith.addf %417, %422 : vector<16x1xf32>
    %cst_212 = arith.constant 2.000000e+00 : f32
    %424 = vector.broadcast %cst_212 : f32 to vector<16x1xf32>
    %425 = arith.mulf %424, %413 : vector<16x1xf32>
    %426 = arith.mulf %425, %417 : vector<16x1xf32>
    %427 = arith.addf %420, %426 : vector<16x1xf32>
    %cst_213 = arith.constant 5.120000e+02 : f32
    %428 = vector.broadcast %cst_213 : f32 to vector<16x1xf32>
    %429 = arith.mulf %428, %413 : vector<16x1xf32>
    %430 = arith.mulf %429, %413 : vector<16x1xf32>
    %431 = arith.addf %427, %430 : vector<16x1xf32>
    %432 = vector.extract_strided_slice %423 {offsets = [0, 0], sizes = [8, 1], strides = [1, 1]} : vector<16x1xf32> to vector<8x1xf32>
    %433 = vector.extract_strided_slice %431 {offsets = [0, 0], sizes = [8, 1], strides = [1, 1]} : vector<16x1xf32> to vector<8x1xf32>
    %434 = vector.extract_strided_slice %423 {offsets = [8, 0], sizes = [8, 1], strides = [1, 1]} : vector<16x1xf32> to vector<8x1xf32>
    %435 = arith.addf %432, %434 : vector<8x1xf32>
    %436 = vector.extract_strided_slice %431 {offsets = [8, 0], sizes = [8, 1], strides = [1, 1]} : vector<16x1xf32> to vector<8x1xf32>
    %437 = arith.addf %433, %436 : vector<8x1xf32>
    %cst_214 = arith.constant 9.765625E-4 : f32
    %438 = vector.broadcast %cst_214 : f32 to vector<8x1xf32>
    %439 = arith.mulf %435, %438 : vector<8x1xf32>
    %cst_215 = arith.constant 9.765625E-4 : f32
    %440 = vector.broadcast %cst_215 : f32 to vector<8x1xf32>
    %441 = arith.mulf %437, %440 : vector<8x1xf32>
    %442 = arith.mulf %439, %439 : vector<8x1xf32>
    %443 = arith.subf %441, %442 : vector<8x1xf32>
    %c4 = arith.constant 4 : index
    %c0_216 = arith.constant 0 : index
    %c0_217 = arith.constant 0 : index
    %444 = vector.load %arg3[%c4, %c0_216, %c0_217] : memref<6x8x1xf32, #tpu.memory_space<vmem>>, vector<1x8x1xf32>
    %445 = vector.shape_cast %444 : vector<1x8x1xf32> to vector<8x1xf32>
    %cst_218 = arith.constant 9.99999974E-6 : f32
    %446 = vector.broadcast %cst_218 : f32 to vector<8x1xf32>
    %447 = arith.addf %443, %446 : vector<8x1xf32>
    %448 = math.rsqrt %447 : vector<8x1xf32>
    %449 = arith.mulf %445, %448 : vector<8x1xf32>
    %c5 = arith.constant 5 : index
    %c0_219 = arith.constant 0 : index
    %c0_220 = arith.constant 0 : index
    %450 = vector.load %arg3[%c5, %c0_219, %c0_220] : memref<6x8x1xf32, #tpu.memory_space<vmem>>, vector<1x8x1xf32>
    %451 = vector.shape_cast %450 : vector<1x8x1xf32> to vector<8x1xf32>
    %452 = tpu.concatenate %449, %449 in 0 : vector<8x1xf32>, vector<8x1xf32> -> vector<16x1xf32>
    %453 = tpu.concatenate %439, %439 in 0 : vector<8x1xf32>, vector<8x1xf32> -> vector<16x1xf32>
    %454 = tpu.concatenate %451, %451 in 0 : vector<8x1xf32>, vector<8x1xf32> -> vector<16x1xf32>
    %455 = arith.subf %413, %453 : vector<16x1xf32>
    %456 = arith.mulf %452, %455 : vector<16x1xf32>
    %457 = arith.addf %456, %454 : vector<16x1xf32>
    %458 = vector.broadcast %452 : vector<16x1xf32> to vector<16x512xf32>
    %459 = arith.mulf %415, %458 : vector<16x512xf32>
    %460 = vector.broadcast %457 : vector<16x1xf32> to vector<16x512xf32>
    %461 = arith.addf %459, %460 : vector<16x512xf32>
    %cst_221 = arith.constant 0.000000e+00 : f32
    %462 = vector.broadcast %cst_221 : f32 to vector<16x512xf32>
    %463 = arith.maximumf %461, %462 : vector<16x512xf32>
    %c0_222 = arith.constant 0 : index
    %c0_223 = arith.constant 0 : index
    %464 = vector.load %arg4[%c0_222, %c0_223] : memref<16x512xf32, #tpu.memory_space<vmem>>, vector<16x512xf32>
    tpu.vector_store %arg4[%c0_222, %c0_223], %463 {strides = array<i32>} : memref<16x512xf32, #tpu.memory_space<vmem>>, vector<16x512xf32>,
    return
  }
}

</mosaic_0001>

<bundles_post_ra>
// kernel: forward_pallas.1
= control target key start
LH: loop header
LB: loop body
LE: loop exit
PB: predicated region body
PF: predicated region fallthrough
CT: control target
= control target key end

     0   :  { %9 = vsyncpa [#allocation4], 0  ;;  %s3677_s0 = inlined_call_operand.vmem [shape: f32[2,4], index: 0, kind: input, shape index: {}]   ;;  %s3678_s1 = inlined_call_operand.vmem [shape: f32[8,658], index: 1, kind: input, shape index: {}]   ;;  %s3679_s2 = inlined_call_operand.vmem [shape: f32[4,16,224], index: 2, kind: input, shape index: {}]   ;;  %s3680_s3 = inlined_call_operand.vmem [shape: f32[6,8,1], index: 3, kind: input, shape index: {}]   ;;  %s3681_s4 = inlined_call_operand.vmem [shape: f32[16,512], index: 4, kind: output, shape index: {}]  }
   0x1   :  { %s16_s17 = sshll.u32 %s3677_s0, 4  ;;  %s17_s17 = int_to_ptr.vmem [resolvable:$true] %s16_s17 }
   0x2   :  { %s2030_s18 = scalar_lea.vmem %s17_s17, 32  ;;  %p2035_p1 = scmp.lt.s32.totalorder %s17_s17, %s17_s17 }
   0x3   :  { %p2031_p0 = scmp.ne.s32.totalorder %s17_s17, %s2030_s18  ;;  %p2036_p2 = scmp.lt.s32.totalorder %s2030_s18, %s2030_s18 }
   0x5   :  { %p2037_p3 = por %p2036_p2, %p2035_p1 }
   0x7   :  { %p2038_p4 = pnand %p2037_p3, %p2031_p0 }
   0x9   :  { %2041 = shalt.err (!%p2038_p4)
}
   0xa   :  { %s2044_s19 = smov [#allocation3]  }
   0xb   :  { %19 = dma.vmem_to_smem %s17_s17, 32, %s2044_s19, [#allocation4]  }
   0xc   :  { %2042 = dma.done.wait [#allocation4], 32  }
   0xd   :  { %2043 = vsyncadd [#allocation4], 4294967264 }
   0xe   :  { %29 = sfence }
   0xf   :  { %v2096_v0 = vld [vmem:[%s3678_s1 + $0x20] sm:$0xff]  ;;  %v2101_v1 = vld [vmem:[%s3678_s1 + $0x10] sm:$0xff]  ;;  %v2106_v2 = vld [vmem:[%s3678_s1 + $0x8] sm:$0xff]  ;;  %s2045_s29 = smov 127   ;;  %s2046_s30 = smov 126   ;;  %v31_v8 = vlaneseq  ;;  %v3758_v27 = vmov 0 }
  0x10   :  { %v1757_v3 = vpack.i.bf16 %v2101_v1, %v2096_v0  ;;  %v2112_v4 = vpack.i.bf16 %v2101_v1, %v2106_v2  ;;  %v2117_v5 = vld [vmem:[%s3678_s1] sm:$0xff]  ;;  %v2122_v6 = vld [vmem:[%s3678_s1 + $0x18] sm:$0xff]  ;;  %s2047_s5 = smov 120   ;;  %s2048_s6 = smov 119   ;;  %v2208_v13 = vld [vmem:[%s3678_s1 + $0x28] sm:$0xff]  ;;  %v3760_v33 = vmov 0  ;;  %v2398_v61 = vpack.i.bf16 %v2096_v0, %v2106_v2 }
  0x11   :  { %v2129_v7 = vpack.i.bf16 %v2122_v6, %v2117_v5  ;;  %s2049_s7 = smov 118   ;;  %s2050_s8 = smov 112   ;;  %v2193_v9 = vand.u32 127, %v31_v8  ;;  %v1942_v11 = vpack.i.bf16 %v2106_v2, %v2122_v6  ;;  %v2217_v15 = vpack.i.bf16 %v2208_v13, %v2096_v0  ;;  %v1538_v37 = vld [vmem:[%s3679_s2 + $0x48] sm:$0xff] }
  0x12   :  { %1758 = vrot.lane.b32.xlu1 %v1757_v3, %s2045_s29  ;;  %1748 = vrot.lane.b32.xlu0 %v2112_v4, %s2045_s29  ;;  %s2051_s9 = smov 111   ;;  %s2052_s10 = smov 110   ;;  %v3762_v35 = vmov 0  ;;  %v3766_v38 = vmov 0  ;;  %v3770_v40 = vmov 0  ;;  %vm3690_vm14 = vcmask 1039360  }
  0x13   :  { %s2053_s11 = smov 64   ;;  %s2054_s12 = smov 63   ;;  %v2198_v10 = vadd.s32 128, %v2193_v9  ;;  %v2211_v14 = vadd.s32 384, %v2193_v9  ;;  %v2223_v18 = vadd.s32 256, %v2193_v9  ;;  %v40_v19 = vshra.s32 %v2193_v9, 3 }
  0x14   :  { %s2055_s13 = smov 62   ;;  %s2056_s14 = smov 56   ;;  %v36_v24 = vshra.s32 %v2193_v9, 6  ;;  %v48_v32 = vand.u32 7, %v2193_v9  ;;  %v3774_v44 = vmov 0  ;;  %v3778_v48 = vmov 0 }
  0x15   :  { %s2057_s15 = smov 55   ;;  %s2058_s16 = smov 54   ;;  %v41_v12 = vshra.s32 %v2198_v10, 3  ;;  %v37_v16 = vshra.s32 %v2198_v10, 6  ;;  %v49_v20 = vand.u32 7, %v2198_v10  ;;  %v43_v21 = vshra.s32 %v2211_v14, 3 }
  0x16   :  { %1763 = vrot.lane.b32.xlu1 %v2112_v4, %s2046_s30  ;;  %1753 = vrot.lane.b32.xlu0 %v2129_v7, %s2045_s29  ;;  %s2059_s17 = smov 48   ;;  %s2060_s18 = smov 47   ;;  %v42_v23 = vshra.s32 %v2223_v18, 3  ;;  %v2240_v25 = vand.u32 7, %v40_v19  ;;  %v39_v28 = vshra.s32 %v2211_v14, 6  ;;  %v38_v30 = vshra.s32 %v2223_v18, 6 }
  0x17   :  { %s2061_s19 = smov 46   ;;  %v2220_v17 = vand.u32 7, %v41_v12  ;;  %vm2233_vm0 = vcmp.ge.s32.totalorder %v37_v16, 1  ;;  %vm2250_vm3 = vcmp.ge.s32.totalorder %v49_v20, 1  ;;  %v2255_v29 = vand.u32 7, %v43_v21  ;;  %s2350_s22 = sld [smem:[#allocation3]] }
  0x18   :  { %v3759_v27 = vsel %vm2250_vm3, 4294967295, %v3758_v27  ;;  %v2261_v31 = vand.u32 7, %v42_v23  ;;  %vm2266_vm4 = vcmp.ge.s32.totalorder %v36_v24, 1  ;;  %vm3682_vm5 = vcmp.ge.s32.totalorder %v2240_v25, 1  ;;  %s2363_s0 = sld [smem:[#allocation3 + $0x1]]  ;;  %s2390_s23 = sld [smem:[#allocation3 + $0x2]] }
  0x19   :  { %vm3684_vm1 = vcmp.ge.s32.totalorder %v2220_v17, 1  ;;  %v3761_v33 = vsel %vm2266_vm4, 4294967295, %v3760_v33  ;;  %v51_v34 = vand.u32 7, %v2211_v14  ;;  %vm2278_vm7 = vcmp.ge.s32.totalorder %v39_v28, 1  ;;  %vm2291_vm9 = vmand %vm2266_vm4, %vm3682_vm5  ;;  %s2431_s24 = sld [smem:[#allocation3 + $0x80]]  ;;  %s2444_s25 = sld [smem:[#allocation3 + $0x81]] }
  0x1a   :  { %1773 = vrot.lane.b32.xlu1 %v2129_v7, %s2046_s30  ;;  %1768 = vrot.lane.b32.xlu0 %v2112_v4, %s2047_s5  ;;  %vm2246_vm2 = vmand %vm2233_vm0, %vm3684_vm1  ;;  %v3763_v35 = vsel %vm2278_vm7, 4294967295, %v3762_v35  ;;  %vm3683_vm8 = vcmp.ge.s32.totalorder %v2255_v29, 1  ;;  %v50_v36 = vand.u32 7, %v2223_v18  ;;  %vm2297_vm10 = vcmp.ge.s32.totalorder %v38_v30, 1  ;;  %v1534_v21 = vld [vmem:[%s3679_s2 + $0x28] sm:$0xff] }
  0x1b   :  { %vm73_vm6 = vmand %vm2246_vm2, %vm2250_vm3  ;;  %v3767_v38 = vsel %vm2297_vm10, 4294967295, %v3766_v38  ;;  %vm3685_vm11 = vcmp.ge.s32.totalorder %v2261_v31, 1  ;;  %vm2308_vm13 = vcmp.ge.s32.totalorder %v48_v32, 1  ;;  %v2357_v49 = vpack.i.bf16 %v2122_v6, %v2101_v1 }
  0x1c   :  { %vm2304_vm12 = vmpackc.low %vm2246_vm2, %vm73_vm6  ;;  %v3771_v40 = vsel %vm2308_vm13, 4294967295, %v3770_v40  ;;  %vm2324_vm6 = vcmp.ge.s32.totalorder %v51_v34, 1  ;;  %vm2342_vm1 = vcmp.ge.s32.totalorder %v50_v36, 1  ;;  %v3780_v54 = vmov 0 }
  0x1d   :  { %vm2318_vm15 = vmand %vm2278_vm7, %vm3683_vm8  ;;  %v3775_v44 = vsel %vm2324_vm6, 4294967295, %v3774_v44  ;;  %v3779_v48 = vsel %vm2342_vm1, 4294967295, %v3778_v48  ;;  %vm2411_vm5 = vcmp.lt.s32.totalorder %v48_v32, 7  ;;  %v3787_v63 = vmov 0 }
  0x1e   :  { %1783 = vrot.lane.b32.xlu1 %v1757_v3, %s2046_s30  ;;  %1778 = vrot.lane.b32.xlu0 %v2129_v7, %s2047_s5  ;;  %vm2336_vm8 = vmand %vm2297_vm10, %vm3685_vm11  ;;  %vm2373_vm10 = vcmp.lt.s32.totalorder %v49_v20, 7  ;;  %v3788_v63 = vsel %vm2411_vm5, 4294967295, %v3787_v63  ;;  %v3796_v23 = vmov 0  ;;  %v2479_v32 = vstv %s2363_s0 }
  0x1f   :  { %vm72_vm11 = vmand %vm2291_vm9, %vm2308_vm13  ;;  %v3781_v54 = vsel %vm2373_vm10, 4294967295, %v3780_v54  ;;  %vm3789_vm13 = vcmask 1039360   ;;  %v3944_v10 = vmov 0  ;;  %v3951_v9 = vmov 0 }
  0x20   :  { %vm3790_vm4 = vmmov %vm3789_vm13 }
  0x21   :  { %vm3791_vm3 = vmmov %vm3790_vm4 }
  0x22   :  { %1793 = vrot.lane.b32.xlu1 %v2112_v4, %s2048_s6  ;;  %1788 = vrot.lane.b32.xlu0 %v1757_v3, %s2047_s5 }
  0x26   :  { %1803 = vrot.lane.b32.xlu1 %v2129_v7, %s2048_s6  ;;  %1798 = vrot.lane.b32.xlu0 %v2112_v4, %s2049_s7 }
  0x2a   :  { %1813 = vrot.lane.b32.xlu1 %v1757_v3, %s2048_s6  ;;  %1808 = vrot.lane.b32.xlu0 %v2129_v7, %s2049_s7 }
  0x2e   :  { %1823 = vrot.lane.b32.xlu1 %v2112_v4, %s2050_s8  ;;  %1818 = vrot.lane.b32.xlu0 %v1757_v3, %s2049_s7 }
  0x32   :  { %1833 = vrot.lane.b32.xlu1 %v2129_v7, %s2050_s8  ;;  %1828 = vrot.lane.b32.xlu0 %v2112_v4, %s2051_s9 }
  0x36   :  { %347 = vrot.lane.b32.xlu1 %v2096_v0, %s2050_s8  ;;  %1838 = vrot.lane.b32.xlu0 %v2129_v7, %s2051_s9 }
  0x3a   :  { %1843 = vrot.lane.b32.xlu1 %v2112_v4, %s2052_s10  ;;  %378 = vrot.lane.b32.xlu0 %v2096_v0, %s2051_s9 }
  0x3e   :  { %1853 = vrot.lane.b32.xlu1 %v2129_v7, %s2052_s10  ;;  %1848 = vrot.lane.b32.xlu0 %v2112_v4, %s2053_s11 }
  0x42   :  { %431 = vrot.lane.b32.xlu1 %v2096_v0, %s2052_s10  ;;  %1858 = vrot.lane.b32.xlu0 %v2129_v7, %s2053_s11 }
  0x46   :  { %1863 = vrot.lane.b32.xlu1 %v2112_v4, %s2054_s12  ;;  %466 = vrot.lane.b32.xlu0 %v2096_v0, %s2053_s11  ;;  %s2548_s11 = sld [smem:[#allocation3 + $0x83]] }
  0x4a   :  { %1873 = vrot.lane.b32.xlu1 %v2129_v7, %s2054_s12  ;;  %1868 = vrot.lane.b32.xlu0 %v2112_v4, %s2055_s13 }
  0x4e   :  { %515 = vrot.lane.b32.xlu1 %v2096_v0, %s2054_s12  ;;  %1878 = vrot.lane.b32.xlu0 %v2129_v7, %s2055_s13 }
  0x52   :  { %1883 = vrot.lane.b32.xlu1 %v2112_v4, %s2056_s14  ;;  %550 = vrot.lane.b32.xlu0 %v2096_v0, %s2055_s13 }
  0x56   :  { %1893 = vrot.lane.b32.xlu1 %v2129_v7, %s2056_s14  ;;  %1888 = vrot.lane.b32.xlu0 %v2112_v4, %s2057_s15 }
  0x5a   :  { %599 = vrot.lane.b32.xlu1 %v2096_v0, %s2056_s14  ;;  %1898 = vrot.lane.b32.xlu0 %v2129_v7, %s2057_s15 }
  0x5e   :  { %1903 = vrot.lane.b32.xlu1 %v2112_v4, %s2058_s16  ;;  %622 = vrot.lane.b32.xlu0 %v2096_v0, %s2057_s15 }
  0x62   :  { %1913 = vrot.lane.b32.xlu1 %v2129_v7, %s2058_s16  ;;  %1908 = vrot.lane.b32.xlu0 %v2112_v4, %s2059_s17 }
  0x66   :  { %667 = vrot.lane.b32.xlu1 %v2096_v0, %s2058_s16  ;;  %1918 = vrot.lane.b32.xlu0 %v2129_v7, %s2059_s17 }
  0x6a   :  { %1923 = vrot.lane.b32.xlu1 %v2112_v4, %s2060_s18  ;;  %702 = vrot.lane.b32.xlu0 %v2096_v0, %s2059_s17 }
  0x6e   :  { %1933 = vrot.lane.b32.xlu1 %v2129_v7, %s2060_s18  ;;  %1928 = vrot.lane.b32.xlu0 %v2112_v4, %s2061_s19  ;;  %v2565_v4 = vstv %s2431_s24 }
  0x72   :  { %751 = vrot.lane.b32.xlu1 %v2096_v0, %s2060_s18  ;;  %1938 = vrot.lane.b32.xlu0 %v2129_v7, %s2061_s19 }
  0x76   :  { %1943 = vrot.lane.b32.xlu1 %v1942_v11, %s2045_s29  ;;  %786 = vrot.lane.b32.xlu0 %v2096_v0, %s2061_s19 }
  0x7a   :  { %1953 = vrot.lane.b32.xlu1 %v1942_v11, %s2046_s30  ;;  %1948 = vrot.lane.b32.xlu0 %v2217_v15, %s2045_s29 }
  0x7e   :  { %1963 = vrot.lane.b32.xlu1 %v2217_v15, %s2046_s30  ;;  %1958 = vrot.lane.b32.xlu0 %v1942_v11, %s2047_s5  ;;  %s2466_s30 = sld [smem:[#allocation3 + $0x3]] }
  0x82   :  { %1973 = vrot.lane.b32.xlu1 %v1942_v11, %s2048_s6  ;;  %1968 = vrot.lane.b32.xlu0 %v2217_v15, %s2047_s5  ;;  %s2481_s5 = sld [smem:[#allocation3 + $0x82]] }
  0x84   :  { %v2312_v41 = vpop.permute.xlu1 %1758  ;;  %v1749_v42 = vpop.permute.xlu0 %1748 }
  0x85   :  { %v1751_v45 = vunpack.i.h.bf16 %v1749_v42  ;;  %v1750_v46 = vunpack.i.l.bf16 %v1749_v42  ;;  %v1760_v50 = vunpack.i.l.bf16 %v2312_v41 }
  0x86   :  { %1983 = vrot.lane.b32.xlu1 %v2217_v15, %s2048_s6  ;;  %1978 = vrot.lane.b32.xlu0 %v1942_v11, %s2049_s7 }
  0x87   :  { %v114_v51 = vsel %vm3690_vm14, %v1750_v46, %v1751_v45  ;;  %vm2386_vm14 = vmpackc.low %vm2291_vm9, %vm72_vm11 }
  0x88   :  { %v2371_v52 = vpop.permute.xlu1 %1763  ;;  %v1754_v53 = vpop.permute.xlu0 %1753  ;;  %v1559_v55 = vpack.c.bf16 %v114_v51, %v2106_v2  ;;  %vm3784_vm11 = vmand %vm2318_vm15, %vm2324_vm6 }
  0x89   :  { %v1766_v56 = vunpack.i.h.bf16 %v2371_v52  ;;  %v1765_v57 = vunpack.i.l.bf16 %v2371_v52  ;;  %v1756_v58 = vunpack.i.h.bf16 %v1754_v53  ;;  %v1755_v59 = vunpack.i.l.bf16 %v1754_v53  ;;  %vm2407_vm7 = vmpackc.low %vm2318_vm15, %vm3784_vm11 }
  0x8a   :  { %1993 = vrot.lane.b32.xlu1 %v2357_v49, %s2050_s8  ;;  %1988 = vrot.lane.b32.xlu0 %v2217_v15, %s2049_s7  ;;  %vm3792_vm11 = vmand %vm2336_vm8, %vm2342_vm1  ;;  %v1201_v53 = vmul.f32 %v1534_v21, %v2479_v32 }
  0x8b   :  { %1560 = vmatprep.subr.msk.bf16.mxu0 %vm2304_vm12, %v1559_v55  ;;  %v113_v0 = vsel %vm3789_vm13, %v1755_v59, %v1750_v46  ;;  %v116_v2 = vsel %vm3790_vm4, %v1756_v58, %v1760_v50  ;;  %v115_v3 = vsel %vm3791_vm3, %v1751_v45, %v1756_v58  ;;  %vm2427_vm6 = vmpackc.low %vm2336_vm8, %vm3792_vm11  ;;  %vm3701_vm12 = vcmask 982016  }
  0x8c   :  { %v2433_v7 = vpop.permute.xlu1 %1773  ;;  %v2435_v8 = vpop.permute.xlu0 %1768  ;;  %v1562_v11 = vpack.c.bf16 %v113_v0, %v2117_v5  ;;  %v1643_v12 = vpack.c.bf16 %v116_v2, %v2122_v6  ;;  %v1646_v15 = vpack.c.bf16 %v115_v3, %v2101_v1  ;;  %vm143_vm3 = vmand %vm2246_vm2, %vm2373_vm10  ;;  %vm3795_vm4 = vcmask 1031168   ;;  %v1189_v1 = vld [vmem:[%s3679_s2 + $0x8] sm:$0xff]  ;;  %v1236_v3 = vld [vmem:[%s3679_s2 + $0x18] sm:$0xff] }
  0x8d   :  { %v171_v19 = vsel %vm3795_vm4, %v1765_v57, %v1766_v56  ;;  %v1771_v5 = vunpack.i.h.bf16 %v2435_v8  ;;  %v1770_v20 = vunpack.i.l.bf16 %v2435_v8  ;;  %v2461_v6 = vstv %s2350_s22  ;;  %vm3804_vm2 = vmand %vm2291_vm9, %vm2411_vm5 }
  0x8e   :  { %2003 = vrot.lane.b32.xlu1 %v2398_v61, %s2050_s8  ;;  %1998 = vrot.lane.b32.xlu0 %v2357_v49, %s2051_s9  ;;  %vm2474_vm11 = vcmp.lt.s32.totalorder %v51_v34, 7  ;;  %v1775_v39 = vunpack.i.l.bf16 %v2433_v7  ;;  %vm3798_vm4 = vnez %v3759_v27  ;;  %v3802_v46 = vmov 0  ;;  %v1550_v34 = vld [vmem:[%s3679_s2 + $0x58] sm:$0xff] }
  0x8f   :  { %v3797_v23 = vsel %vm2474_vm11, 4294967295, %v3796_v23  ;;  %v206_v42 = vsel %vm3701_vm12, %v1770_v20, %v1771_v5  ;;  %1563 = vmatpush1.bf16.msk.msra.mxu0 %vm2386_vm14, %v1562_v11  ;;  %1644 = vmatprep.subr.msk.bf16.mxu1 %vm2407_vm7, %v1643_v12  ;;  %vm3799_vm13 = vmand %vm2233_vm0, %vm3798_vm4  ;;  %vm2505_vm14 = vcmp.lt.s32.totalorder %v50_v36, 7  ;;  %vm3805_vm7 = vnez %v3761_v33 }
  0x90   :  { %vm2499_vm1 = vmpackc.low %vm3799_vm13, %vm143_vm3  ;;  %v1565_v45 = vpack.c.bf16 %v206_v42, %v171_v19  ;;  %v3803_v46 = vsel %vm2505_vm14, 4294967295, %v3802_v46  ;;  %1647 = vmatpush1.bf16.msk.msra.mxu1 %vm2427_vm6, %v1646_v15  ;;  %v2511_v26 = vpop.permute.xlu1 %1783  ;;  %v1779_v50 = vpop.permute.xlu0 %1778  ;;  %vm3806_vm3 = vnez %v3771_v40  ;;  %v1192_v51 = vmul.f32 %v2461_v6, %v1189_v1  ;;  %v1547_v15 = vld [vmem:[%s3679_s2 + $0x38] sm:$0xff] }
  0x91   :  { %vm3807_vm13 = vmand %vm3805_vm7, %vm3806_vm3  ;;  %v1780_v55 = vunpack.i.l.bf16 %v1779_v50  ;;  %v2537_v58 = vstv %s2390_s23  ;;  %v1776_v59 = vunpack.i.h.bf16 %v2433_v7  ;;  %v1781_v60 = vunpack.i.h.bf16 %v1779_v50 }
  0x92   :  { %vm2523_vm12 = vmpackc.low %vm3807_vm13, %vm3804_vm2  ;;  %2008 = vrot.lane.b32.xlu0 %v2398_v61, %s2051_s9  ;;  %1566 = vmatprep.subr.msk.bf16.mxu0 %vm2499_vm1, %v1565_v45  ;;  %vm3810_vm2 = vnez %v3775_v44  ;;  %vm3811_vm13 = vnez %v3763_v35  ;;  %vm3812_vm3 = vcmask 1031168   ;;  %v1785_v0 = vunpack.i.l.bf16 %v2511_v26 }
  0x93   :  { %v170_v62 = vsel %vm3812_vm3, %v1775_v39, %v1765_v57  ;;  %vm3813_vm4 = vcmask 982016   ;;  %1083 = vrot.lane.b32.xlu1 %v2208_v13, %s2050_s8  ;;  %vm3815_vm3 = vnez %v3767_v38  ;;  %v1203_v11 = vadd.f32 %v1201_v53, %v1192_v51  ;;  %v1542_v39 = vld [vmem:[%s3679_s2 + $0x68] sm:$0xff]  ;;  %vm3817_vm6 = vmand %vm2318_vm15, %vm2474_vm11 }
  0x94   :  { %v205_v2 = vsel %vm3813_vm4, %v1780_v55, %v1770_v20  ;;  %v2567_v7 = vpop.permute.xlu1 %1793  ;;  %v2569_v8 = vpop.permute.xlu0 %1788  ;;  %vm3814_vm4 = vnez %v3779_v48  ;;  %v1214_v12 = vmul.f32 %v1538_v37, %v2537_v58  ;;  %v2580_v19 = vstv %s2444_s25  ;;  %vm3818_vm7 = vmand %vm3811_vm13, %vm3810_vm2 }
  0x95   :  { %v1568_v57 = vpack.c.bf16 %v205_v2, %v170_v62  ;;  %v1796_v20 = vunpack.i.h.bf16 %v2567_v7  ;;  %v1795_v1 = vunpack.i.l.bf16 %v2567_v7  ;;  %v1790_v21 = vunpack.i.l.bf16 %v2569_v8  ;;  %vm2609_vm5 = vmpackc.low %vm3818_vm7, %vm3817_vm6  ;;  %v1188_v62 = vld [vmem:[%s3679_s2] sm:$0xff] }
  0x96   :  { %v2589_v42 = vstv %s2466_s30  ;;  %vm3816_vm9 = vcmask 982016   ;;  %1113 = vrot.lane.b32.xlu0 %v2208_v13, %s2051_s9  ;;  %v2615_v51 = vstv %s2481_s5  ;;  %vm3823_vm15 = vcmask 982016   ;;  %vm3824_vm7 = vmand %vm2336_vm8, %vm2505_vm14 }
  0x97   :  { %v207_v45 = vsel %vm3816_vm9, %v1771_v5, %v1781_v60  ;;  %1569 = vmatpush1.bf16.msk.msra.mxu0 %vm2523_vm12, %v1568_v57  ;;  %v1239_v5 = vmul.f32 %v2565_v4, %v1236_v3  ;;  %vm3821_vm12 = vcmask 1031168   ;;  %v208_v53 = vsel %vm3823_vm15, %v1781_v60, %v1790_v21  ;;  %2013 = vrot.lane.b32.xlu1 %v2357_v49, %s2052_s10  ;;  %vm3825_vm6 = vmand %vm3815_vm3, %vm3814_vm4 }
  0x98   :  { %v172_v43 = vsel %vm3821_vm12, %v1766_v56, %v1776_v59  ;;  %vm3822_vm9 = vmmov %vm3821_vm12  ;;  %v1246_v56 = vmul.f32 %v1547_v15, %v2580_v19  ;;  %v2639_v37 = vpop.permute.xlu1 %1803  ;;  %v2641_v49 = vpop.permute.xlu0 %1798  ;;  %v1216_v47 = vadd.f32 %v1214_v12, %v1203_v11  ;;  %v1256_v60 = vmul.f32 %v1550_v34, %v2615_v51  ;;  %v1553_v11 = vld [vmem:[%s3679_s2 + $0x78] sm:$0xff] }
  0x99   :  { %v173_v36 = vsel %vm3822_vm9, %v1776_v59, %v1785_v0  ;;  %vm2634_vm1 = vmpackc.low %vm3825_vm6, %vm3824_vm7  ;;  %v1227_v59 = vmul.f32 %v1542_v39, %v2589_v42  ;;  %v1652_v0 = vpack.c.bf16 %v207_v45, %v172_v43  ;;  %vm3828_vm12 = vcmask 973824   ;;  %v1533_v45 = vld [vmem:[%s3679_s2 + $0x20] sm:$0xff] }
  0x9a   :  { %v1649_v55 = vpack.c.bf16 %v208_v53, %v173_v36  ;;  %vm267_vm8 = vmand %vm2233_vm0, %vm2373_vm10  ;;  %v255_v2 = vsel %vm3828_vm12, %v1795_v1, %v1796_v20  ;;  %v1801_v3 = vunpack.i.h.bf16 %v2641_v49  ;;  %v1800_v57 = vunpack.i.l.bf16 %v2641_v49  ;;  %2018 = vrot.lane.b32.xlu0 %v2398_v61, %s2052_s10  ;;  %v1546_v61 = vld [vmem:[%s3679_s2 + $0x30] sm:$0xff] }
  0x9b   :  { %vm3829_vm9 = vnez %v3788_v63  ;;  %vm3830_vm15 = vnez %v3761_v33  ;;  %v1248_v12 = vadd.f32 %v1246_v56, %v1239_v5  ;;  %v2672_v15 = vstv %s2548_s11  ;;  %1165 = vrot.lane.b32.xlu1 %v2208_v13, %s2052_s10  ;;  %v1537_v13 = vld [vmem:[%s3679_s2 + $0x40] sm:$0xff]  ;;  %vm269_vm6 = vmand %vm3811_vm13, %vm2474_vm11 }
  0x9c   :  { %vm266_vm7 = vmand %vm3830_vm15, %vm3829_vm9  ;;  %1650 = vmatprep.subr.msk.bf16.mxu1 %vm2609_vm5, %v1649_v55  ;;  %v1805_v21 = vunpack.i.l.bf16 %v2639_v37  ;;  %vm3831_vm12 = vcmask 965632   ;;  %v1191_v34 = vmul.f32 %v2461_v6, %v1188_v62  ;;  %v2698_v5 = vpop.permute.xlu1 %1813  ;;  %v1809_v43 = vpop.permute.xlu0 %1808  ;;  %v1229_v53 = vadd.f32 %v1227_v59, %v1216_v47  ;;  %v1541_v55 = vld [vmem:[%s3679_s2 + $0x60] sm:$0xff]  ;;  %v1235_v47 = vld [vmem:[%s3679_s2 + $0x10] sm:$0xff] }
  0x9d   :  { %v290_v39 = vsel %vm3831_vm12, %v1800_v57, %v1801_v3  ;;  %1653 = vmatpush1.bf16.msk.msra.mxu1 %vm2634_vm1, %v1652_v0  ;;  %vm2687_vm5 = vmpackc.low %vm267_vm8, %vm2233_vm0  ;;  %v1258_v52 = vadd.f32 %v1256_v60, %v1248_v12  ;;  %v1266_v56 = vmul.f32 %v1553_v11, %v2672_v15  ;;  %v1806_v49 = vunpack.i.h.bf16 %v2639_v37 }
  0x9e   :  { %v1571_v50 = vpack.c.bf16 %v290_v39, %v255_v2  ;;  %vm2707_vm1 = vmpackc.low %vm266_vm7, %vm3830_vm15  ;;  %v1811_v62 = vunpack.i.h.bf16 %v1809_v43  ;;  %v1810_v0 = vunpack.i.l.bf16 %v1809_v43  ;;  %vm3836_vm12 = vcmp.lt.s32.totalorder %v2220_v17, 7 }
  0x9f   :  { %vm2720_vm7 = vmand %vm2233_vm0, %vm3836_vm12  ;;  %v1268_v37 = vadd.f32 %v1266_v56, %v1258_v52  ;;  %vm3709_vm9 = vcmask 785408   ;;  %v1200_v22 = vmul.f32 %v1533_v45, %v2479_v32  ;;  %v1213_v59 = vmul.f32 %v1537_v13, %v2537_v58  ;;  %v1549_v45 = vld [vmem:[%s3679_s2 + $0x50] sm:$0xff] }
  0xa0   :  { %1572 = vmatprep.subr.msk.bf16.mxu0 %vm2687_vm5, %v1571_v50  ;;  %vm3839_vm0 = vcmask 973824   ;;  %v1815_v11 = vunpack.i.l.bf16 %v2698_v5  ;;  %vm3840_vm12 = vcmask 965632   ;;  %vm268_vm5 = vmand %vm3815_vm3, %vm2505_vm14  ;;  %v1226_v39 = vmul.f32 %v1541_v55, %v2589_v42  ;;  %v2754_v13 = vpop.permute.xlu0 %1818 }
  0xa1   :  { %v254_v60 = vsel %vm3839_vm0, %v1805_v21, %v1795_v1  ;;  %v289_v12 = vsel %vm3840_vm12, %v1810_v0, %v1800_v57  ;;  %v2752_v21 = vpop.permute.xlu1 %1823  ;;  %vm3841_vm0 = vnez %v3759_v27  ;;  %v1272_v57 = vpack.c.bf16 %v1268_v37, %v1229_v53  ;;  %vm3842_vm8 = vmmov %vm3840_vm12 }
  0xa2   :  { %v1574_v1 = vpack.c.bf16 %v289_v12, %v254_v60  ;;  %v1202_v50 = vadd.f32 %v1200_v22, %v1191_v34  ;;  %v1238_v43 = vmul.f32 %v2565_v4, %v1235_v47  ;;  %v291_v52 = vsel %vm3842_vm8, %v1801_v3, %v1811_v62  ;;  %vm2772_vm12 = vmpackc.low %vm269_vm6, %vm3811_vm13  ;;  %v1552_v3 = vld [vmem:[%s3679_s2 + $0x70] sm:$0xff] }
  0xa3   :  { %v1826_v56 = vunpack.i.h.bf16 %v2752_v21  ;;  %v1825_v55 = vunpack.i.l.bf16 %v2752_v21  ;;  %v1820_v0 = vunpack.i.l.bf16 %v2754_v13  ;;  %vm2788_vm8 = vmpackc.low %vm268_vm5, %vm3815_vm3  ;;  %1554 = vmatprep.mubr.msk.bf16.mxu0 %vm3709_vm9, %v1272_v57  ;;  %v1245_v37 = vmul.f32 %v1546_v61, %v2580_v19 }
  0xa4   :  { %1575 = vmatpush1.bf16.msk.msra.mxu0 %vm2707_vm1, %v1574_v1  ;;  %v1215_v47 = vadd.f32 %v1213_v59, %v1202_v50  ;;  %v1255_v36 = vmul.f32 %v1549_v45, %v2615_v51  ;;  %vm3847_vm1 = vcmask 973824   ;;  %vm3849_vm14 = vcmask 965632   ;;  %vm3850_vm5 = vmand %vm2720_vm7, %vm3841_vm0 }
  0xa5   :  { %v256_v22 = vsel %vm3847_vm1, %v1796_v20, %v1806_v49  ;;  %vm3848_vm11 = vmmov %vm3847_vm1  ;;  %v292_v12 = vsel %vm3849_vm14, %v1811_v62, %v1820_v0  ;;  %vm3712_vm9 = vcmp.lt.s32.totalorder %v2261_v31, 7  ;;  %vm3853_vm10 = vcmask 785408   ;;  %v1834_v20 = vpop.permute.xlu1 %1833 }
  0xa6   :  { %v257_v60 = vsel %vm3848_vm11, %v1806_v49, %v1815_v11  ;;  %vm2808_vm6 = vmpackc.low %vm2720_vm7, %vm3850_vm5  ;;  %1555 = vmatprep.mubr.msk.bf16.mxu1 %vm3853_vm10, %v1272_v57  ;;  %v1829_v49 = vpop.permute.xlu0 %1828  ;;  %vm3854_vm11 = vcmp.lt.s32.totalorder %v2240_v25, 7  ;;  %v1228_v11 = vadd.f32 %v1226_v39, %v1215_v47  ;;  %v1247_v61 = vadd.f32 %v1245_v37, %v1238_v43 }
  0xa7   :  { %v1655_v7 = vpack.c.bf16 %v292_v12, %v257_v60  ;;  %vm2818_vm14 = vmand %vm3830_vm15, %vm3854_vm11  ;;  %v1265_v45 = vmul.f32 %v1552_v3, %v2672_v15  ;;  %v1658_v1 = vpack.c.bf16 %v291_v52, %v256_v22  ;;  %vm3857_vm1 = vcmask 916480  }
  0xa8   :  { %v351_v57 = vsel %vm3857_vm1, %v1825_v55, %v1826_v56  ;;  %v1831_v50 = vunpack.i.h.bf16 %v1829_v49  ;;  %v1830_v0 = vunpack.i.l.bf16 %v1829_v49  ;;  %vm3858_vm10 = vcmp.lt.s32.totalorder %v2255_v29, 7  ;;  %vm2840_vm15 = vmand %vm3815_vm3, %vm3712_vm9 }
  0xa9   :  { %vm2830_vm5 = vmand %vm3811_vm13, %vm3858_vm10  ;;  %1656 = vmatprep.subr.msk.bf16.mxu1 %vm2772_vm12, %v1655_v7  ;;  %v3861_v39 = vmov 0  ;;  %v1257_v43 = vadd.f32 %v1255_v36, %v1247_v61  ;;  %v1835_v52 = vunpack.i.l.bf16 %v1834_v20  ;;  %vm3863_vm11 = vcmask 908288   ;;  %v348_v53 = vpop.permute.xlu1 %347 }
  0xaa   :  { %v3862_v39 = vsel %vm2840_vm15, 4294967295, %v3861_v39  ;;  %v382_v3 = vsel %vm3863_vm11, %v1830_v0, %v1831_v50  ;;  %1659 = vmatpush1.bf16.msk.msra.mxu1 %vm2788_vm8, %v1658_v1  ;;  %vm3864_vm13 = vnez %v3771_v40  ;;  %v1839_v47 = vpop.permute.xlu0 %1838  ;;  %vm325_vm3 = vmand %vm2830_vm5, %vm3810_vm2  ;;  %v1836_v34 = vunpack.i.h.bf16 %v1834_v20 }
  0xab   :  { %vm322_vm12 = vmand %vm2818_vm14, %vm3864_vm13  ;;  %v1577_v35 = vpack.c.bf16 %v382_v3, %v351_v57  ;;  %v1267_v38 = vadd.f32 %v1265_v45, %v1257_v43  ;;  %v1841_v37 = vunpack.i.h.bf16 %v1839_v47  ;;  %v1840_v36 = vunpack.i.l.bf16 %v1839_v47 }
  0xac   :  { %vm324_vm8 = vmand %vm2840_vm15, %vm3814_vm4  ;;  %vm3867_vm10 = vcmask 916480   ;;  %vm3720_vm2 = vcmask 900096  }
  0xad   :  { %1578 = vmatprep.subr.msk.bf16.mxu0 %vm2808_vm6, %v1577_v35  ;;  %vm2863_vm1 = vmpackc.low %vm2818_vm14, %vm322_vm12  ;;  %v2867_v60 = vpack.c.bf16 %v1267_v38, %v1228_v11  ;;  %v350_v12 = vsel %vm3867_vm10, %v1835_v52, %v1825_v55  ;;  %v381_v7 = vsel %vm3863_vm11, %v1840_v36, %v1830_v0  ;;  %v1844_v61 = vpop.permute.xlu1 %1843 }
  0xae   :  { %vm2873_vm9 = vmpackc.low %vm2830_vm5, %vm325_vm3  ;;  %v1580_v20 = vpack.c.bf16 %v381_v7, %v350_v12  ;;  %v379_v45 = vpop.permute.xlu0 %378  ;;  %v1846_v1 = vunpack.i.h.bf16 %v1844_v61  ;;  %v1845_v57 = vunpack.i.l.bf16 %v1844_v61  ;;  %vm3875_vm3 = vnez %v3781_v54 }
  0xaf   :  { %vm3870_vm4 = vmmov %vm3863_vm11 }
  0xb0   :  { %v383_v59 = vsel %vm3870_vm4, %v1831_v50, %v1841_v37  ;;  %vm2880_vm6 = vmpackc.low %vm2840_vm15, %vm324_vm8  ;;  %1581 = vmatpush1.bf16.msk.msra.mxu0 %vm2863_vm1, %v1580_v20  ;;  %vm3877_vm8 = vcmp.ge.s32.totalorder %v2220_v17, 1  ;;  %vm3717_vm15 = vcmask 523264   ;;  %vm3879_vm1 = vcmp.ge.s32.totalorder %v2240_v25, 1 }
  0xb1   :  { %vm3873_vm12 = vmmov %vm3867_vm10  ;;  %v1854_v3 = vpop.permute.xlu1 %1853 }
  0xb2   :  { %v353_v55 = vsel %vm3873_vm12, %v1836_v34, %v348_v53  ;;  %vm3874_vm10 = vmmov %vm3870_vm4  ;;  %v1849_v21 = vpop.permute.xlu0 %1848  ;;  %v1855_v62 = vunpack.i.l.bf16 %v1854_v3  ;;  %v1856_v7 = vunpack.i.h.bf16 %v1854_v3 }
  0xb3   :  { %v384_v0 = vsel %vm3874_vm10, %v1841_v37, %v379_v45  ;;  %vm3876_vm11 = vmmov %vm3873_vm12  ;;  %vm3878_vm10 = vnez %v3788_v63  ;;  %v1851_v35 = vunpack.i.h.bf16 %v1849_v21  ;;  %v1850_v53 = vunpack.i.l.bf16 %v1849_v21 }
  0xb4   :  { %v352_v50 = vsel %vm3876_vm11, %v1826_v56, %v1836_v34  ;;  %v1661_v43 = vpack.c.bf16 %v384_v0, %v353_v55  ;;  %vm447_vm12 = vmand %vm3877_vm8, %vm3841_vm0  ;;  %v435_v56 = vsel %vm3720_vm2, %v1845_v57, %v1846_v1  ;;  %v434_v49 = vsel %vm3720_vm2, %v1855_v62, %v1845_v57 }
  0xb5   :  { %v1664_v52 = vpack.c.bf16 %v383_v59, %v352_v50  ;;  %vm406_vm4 = vmand %vm2818_vm14, %vm3878_vm10  ;;  %v470_v47 = vsel %vm3717_vm15, %v1850_v53, %v1851_v35  ;;  %v432_v36 = vpop.permute.xlu1 %431  ;;  %vm3892_vm0 = vcmp.ge.s32.totalorder %v2261_v31, 1  ;;  %v436_v57 = vsel %vm3720_vm2, %v1846_v1, %v1856_v7 }
  0xb6   :  { %1662 = vmatprep.subr.msk.bf16.mxu1 %vm2873_vm9, %v1661_v43  ;;  %vm446_vm11 = vmand %vm3879_vm1, %vm3864_vm13  ;;  %v1583_v37 = vpack.c.bf16 %v470_v47, %v435_v56  ;;  %v1859_v34 = vpop.permute.xlu0 %1858  ;;  %vm3883_vm1 = vnez %v3797_v23  ;;  %vm3891_vm13 = vnez %v3779_v48  ;;  %v437_v55 = vsel %vm3720_vm2, %v1856_v7, %v432_v36 }
  0xb7   :  { %1665 = vmatpush1.bf16.msk.msra.mxu1 %vm2880_vm6, %v1664_v52  ;;  %vm3880_vm14 = vmand %vm2720_vm7, %vm3875_vm3  ;;  %v1861_v2 = vunpack.i.h.bf16 %v1859_v34  ;;  %v1860_v22 = vunpack.i.l.bf16 %v1859_v34  ;;  %vm3884_vm7 = vnez %v3775_v44  ;;  %vm3890_vm6 = vcmask 523264  }
  0xb8   :  { %vm1582_vm8 = vmpackc.low %vm447_vm12, %vm3880_vm14  ;;  %vm3885_vm12 = vcmp.ge.s32.totalorder %v2255_v29, 1  ;;  %vm624_vm2 = vcmask 449536  }
  0xb9   :  { %vm2918_vm9 = vmpackc.low %vm446_vm11, %vm406_vm4  ;;  %1584 = vmatprep.subr.msk.bf16.mxu0 %vm1582_vm8, %v1583_v37  ;;  %vm3888_vm4 = vnez %v3803_v46  ;;  %vm3889_vm11 = vnez %v3862_v39  ;;  %v469_v59 = vsel %vm3890_vm6, %v1860_v22, %v1850_v53  ;;  %v1864_v45 = vpop.permute.xlu1 %1863 }
  0xba   :  { %vm2930_vm14 = vmand %vm3885_vm12, %vm3884_vm7  ;;  %v1586_v61 = vpack.c.bf16 %v469_v59, %v434_v49  ;;  %v467_v11 = vpop.permute.xlu0 %466  ;;  %v1866_v0 = vunpack.i.h.bf16 %v1864_v45  ;;  %v1865_v50 = vunpack.i.l.bf16 %v1864_v45 }
  0xbb   :  { %vm448_vm10 = vmand %vm3892_vm0, %vm3891_vm13  ;;  %vm552_vm13 = vcmask 506880  }
  0xbc   :  { %vm3893_vm12 = vmmov %vm3890_vm6  ;;  %1587 = vmatpush1.bf16.msk.msra.mxu0 %vm2918_vm9, %v1586_v61  ;;  %vm3898_vm9 = vnez %v3788_v63 }
  0xbd   :  { %v471_v20 = vsel %vm3893_vm12, %v1851_v35, %v1861_v2  ;;  %vm3894_vm8 = vmmov %vm3890_vm6  ;;  %v1874_v3 = vpop.permute.xlu1 %1873 }
  0xbe   :  { %v472_v43 = vsel %vm3894_vm8, %v1861_v2, %v467_v11  ;;  %vm3895_vm6 = vmand %vm2830_vm5, %vm3883_vm1  ;;  %vm517_vm8 = vcmask 515072   ;;  %v1670_v33 = vpack.c.bf16 %v471_v20, %v436_v57  ;;  %v1869_v21 = vpop.permute.xlu0 %1868  ;;  %vm3897_vm5 = vcmp.ge.s32.totalorder %v2220_v17, 1 }
  0xbf   :  { %vm1666_vm15 = vmpackc.low %vm2930_vm14, %vm3895_vm6  ;;  %v1667_v52 = vpack.c.bf16 %v472_v43, %v437_v55  ;;  %v1871_v1 = vunpack.i.h.bf16 %v1869_v21  ;;  %v1870_v56 = vunpack.i.l.bf16 %v1869_v21  ;;  %v519_v39 = vsel %vm517_vm8, %v1865_v50, %v1866_v0 }
  0xc0   :  { %vm3896_vm0 = vmand %vm3889_vm11, %vm3888_vm4  ;;  %v1875_v35 = vunpack.i.l.bf16 %v1874_v3  ;;  %v1876_v2 = vunpack.i.h.bf16 %v1874_v3 }
  0xc1   :  { %vm1669_vm12 = vmpackc.low %vm448_vm10, %vm3896_vm0  ;;  %1668 = vmatprep.subr.msk.bf16.mxu1 %vm1666_vm15, %v1667_v52  ;;  %vm3899_vm10 = vcmp.ge.s32.totalorder %v2240_v25, 1  ;;  %v554_v53 = vsel %vm552_vm13, %v1870_v56, %v1871_v1  ;;  %v516_v62 = vpop.permute.xlu1 %515 }
  0xc2   :  { %vm531_vm14 = vmand %vm3897_vm5, %vm3875_vm3  ;;  %1671 = vmatpush1.bf16.msk.msra.mxu1 %vm1669_vm12, %v1670_v33  ;;  %v1879_v47 = vpop.permute.xlu0 %1878  ;;  %v1589_v38 = vpack.c.bf16 %v554_v53, %v519_v39  ;;  %v518_v12 = vsel %vm517_vm8, %v1875_v35, %v1865_v50  ;;  %v521_v61 = vsel %vm517_vm8, %v1876_v2, %v516_v62  ;;  %v520_v43 = vsel %vm517_vm8, %v1866_v0, %v1876_v2 }
  0xc3   :  { %vm530_vm11 = vmand %vm3899_vm10, %vm3898_vm9  ;;  %v1881_v37 = vunpack.i.h.bf16 %v1879_v47  ;;  %v1880_v36 = vunpack.i.l.bf16 %v1879_v47  ;;  %vm3908_vm8 = vnez %v3759_v27 }
  0xc4   :  { %vm3900_vm15 = vmmov %vm3897_vm5  ;;  %vm3904_vm5 = vcmp.ge.s32.totalorder %v2255_v29, 1 }
  0xc5   :  { %vm1588_vm6 = vmpackc.low %vm531_vm14, %vm3900_vm15  ;;  %v553_v22 = vsel %vm552_vm13, %v1880_v36, %v1870_v56  ;;  %vm3905_vm14 = vcmp.ge.s32.totalorder %v2261_v31, 1  ;;  %v555_v7 = vsel %vm552_vm13, %v1871_v1, %v1881_v37  ;;  %v1884_v49 = vpop.permute.xlu1 %1883 }
  0xc6   :  { %vm3901_vm0 = vmmov %vm3899_vm10  ;;  %1590 = vmatprep.subr.msk.bf16.mxu0 %vm1588_vm6, %v1589_v38  ;;  %v551_v59 = vpop.permute.xlu0 %550  ;;  %v1592_v20 = vpack.c.bf16 %v553_v22, %v518_v12  ;;  %v1886_v45 = vunpack.i.h.bf16 %v1884_v49  ;;  %v1885_v11 = vunpack.i.l.bf16 %v1884_v49  ;;  %v1676_v57 = vpack.c.bf16 %v555_v7, %v520_v43 }
  0xc7   :  { %vm2976_vm12 = vmpackc.low %vm530_vm11, %vm3901_vm0  ;;  %v556_v55 = vsel %vm552_vm13, %v1881_v37, %v551_v59  ;;  %vm3721_vm13 = vmmov 1  }
  0xc8   :  { %vm533_vm10 = vmand %vm3904_vm5, %vm3883_vm1  ;;  %v1673_v50 = vpack.c.bf16 %v556_v55, %v521_v61  ;;  %1593 = vmatpush1.bf16.msk.msra.mxu0 %vm2976_vm12, %v1592_v20  ;;  %v3942_v55 = vmov 0 }
  0xc9   :  { %vm532_vm15 = vmand %vm3905_vm14, %vm3888_vm4  ;;  %v1894_v52 = vpop.permute.xlu1 %1893  ;;  %vm3918_vm4 = vcmp.lt.s32.totalorder %v2240_v25, 7 }
  0xca   :  { %vm3906_vm11 = vmmov %vm3904_vm5  ;;  %v1889_v33 = vpop.permute.xlu0 %1888  ;;  %v1895_v56 = vunpack.i.l.bf16 %v1894_v52  ;;  %v1896_v38 = vunpack.i.h.bf16 %v1894_v52 }
  0xcb   :  { %vm1672_vm6 = vmpackc.low %vm533_vm10, %vm3906_vm11  ;;  %v1891_v3 = vunpack.i.h.bf16 %v1889_v33  ;;  %v1890_v21 = vunpack.i.l.bf16 %v1889_v33  ;;  %vm3909_vm10 = vnez %v3771_v40 }
  0xcc   :  { %vm3907_vm0 = vmmov %vm3905_vm14  ;;  %vm601_vm14 = vcmask 457728   ;;  %1674 = vmatprep.subr.msk.bf16.mxu1 %vm1672_vm6, %v1673_v50  ;;  %vm3912_vm6 = vnez %v3779_v48 }
  0xcd   :  { %vm1675_vm5 = vmpackc.low %vm532_vm15, %vm3907_vm0  ;;  %v603_v1 = vsel %vm601_vm14, %v1885_v11, %v1886_v45  ;;  %v626_v39 = vsel %vm624_vm2, %v1890_v21, %v1891_v3  ;;  %v600_v0 = vpop.permute.xlu1 %599  ;;  %v602_v36 = vsel %vm601_vm14, %v1895_v56, %v1885_v11  ;;  %v604_v43 = vsel %vm601_vm14, %v1886_v45, %v1896_v38 }
  0xce   :  { %1677 = vmatpush1.bf16.msk.msra.mxu1 %vm1675_vm5, %v1676_v57  ;;  %vm1594_vm12 = vmpackc.low %vm3721_vm13, %vm3908_vm8  ;;  %v1899_v35 = vpop.permute.xlu0 %1898  ;;  %v1595_v53 = vpack.c.bf16 %v626_v39, %v603_v1  ;;  %v605_v59 = vsel %vm601_vm14, %v1896_v38, %v600_v0  ;;  %vm3915_vm5 = vcmp.lt.s32.totalorder %v2220_v17, 7  ;;  %v2026_v57 = vld [vmem:[%s3678_s1 + $0x10] sm:$0xff] }
  0xcf   :  { %v1901_v62 = vunpack.i.h.bf16 %v1899_v35  ;;  %v1900_v47 = vunpack.i.l.bf16 %v1899_v35  ;;  %vm1597_vm15 = vmpackc.low %vm3721_vm13, %vm3909_vm10  ;;  %v3925_v35 = vmov 0 }
  0xd0   :  { %1596 = vmatprep.subr.msk.bf16.mxu0 %vm1594_vm12, %v1595_v53  ;;  %vm3013_vm11 = vmpackc.low %vm3721_vm13, %vm3884_vm7 }
  0xd1   :  { %v625_v37 = vsel %vm624_vm2, %v1900_v47, %v1890_v21  ;;  %v627_v2 = vsel %vm624_vm2, %v1891_v3, %v1901_v62  ;;  %v1904_v22 = vpop.permute.xlu1 %1903  ;;  %vm3021_vm0 = vmpackc.low %vm3721_vm13, %vm3912_vm6  ;;  %vm3725_vm13 = vcmask 441344  }
  0xd2   :  { %v623_v12 = vpop.permute.xlu0 %622  ;;  %v1598_v7 = vpack.c.bf16 %v625_v37, %v602_v36  ;;  %v1906_v20 = vunpack.i.h.bf16 %v1904_v22  ;;  %v1905_v61 = vunpack.i.l.bf16 %v1904_v22  ;;  %vm3031_vm12 = vmand %vm3915_vm5, %vm3908_vm8  ;;  %v1682_v52 = vpack.c.bf16 %v627_v2, %v604_v43 }
  0xd3   :  { %v628_v11 = vsel %vm624_vm2, %v1901_v62, %v623_v12  ;;  %vm3040_vm1 = vmand %vm3918_vm4, %vm3909_vm10  ;;  %vm3726_vm2 = vcmask 392192   ;;  %vm3932_vm10 = vcmp.lt.s32.totalorder %v2220_v17, 7  ;;  %v3933_v22 = vmov 0 }
  0xd4   :  { %v1679_v50 = vpack.c.bf16 %v628_v11, %v605_v59  ;;  %1599 = vmatpush1.bf16.msk.msra.mxu0 %vm1597_vm15, %v1598_v7  ;;  %vm1600_vm14 = vmpackc.low %vm3031_vm12, %vm3875_vm3  ;;  %v671_v1 = vsel %vm3725_vm13, %v1905_v61, %v1906_v20  ;;  %vm3921_vm15 = vcmp.lt.s32.totalorder %v2255_v29, 7  ;;  %vm3928_vm13 = vnez %v3797_v23 }
  0xd5   :  { %v1914_v33 = vpop.permute.xlu1 %1913  ;;  %vm3935_vm12 = vcmp.lt.s32.totalorder %v2240_v25, 7  ;;  %v3938_v7 = vmov 0  ;;  %v3987_v12 = vmov 0 }
  0xd6   :  { %v1909_v3 = vpop.permute.xlu0 %1908  ;;  %1680 = vmatprep.subr.msk.bf16.mxu1 %vm3013_vm11, %v1679_v50  ;;  %vm3061_vm11 = vmand %vm3921_vm15, %vm3884_vm7  ;;  %v1915_v39 = vunpack.i.l.bf16 %v1914_v33  ;;  %vm3927_vm15 = vcmp.lt.s32.totalorder %v2220_v17, 7  ;;  %v1916_v36 = vunpack.i.h.bf16 %v1914_v33  ;;  %vm3931_vm7 = vcmask 441344  }
  0xd7   :  { %v1911_v45 = vunpack.i.h.bf16 %v1909_v3  ;;  %v1910_v21 = vunpack.i.l.bf16 %v1909_v3  ;;  %1683 = vmatpush1.bf16.msk.msra.mxu1 %vm3021_vm0, %v1682_v52  ;;  %vm3924_vm0 = vcmp.lt.s32.totalorder %v2261_v31, 7  ;;  %vm767_vm4 = vmand %vm3927_vm15, %vm3875_vm3  ;;  %vm3930_vm15 = vcmask 392192  }
  0xd8   :  { %vm3070_vm5 = vmand %vm3924_vm0, %vm3912_vm6  ;;  %vm3929_vm0 = vnez %v3803_v46  ;;  %v670_v2 = vsel %vm3931_vm7, %v1915_v39, %v1905_v61  ;;  %vm3109_vm6 = vcmp.lt.s32.totalorder %v37_v16, 7  ;;  %v3946_v16 = vmov 0 }
  0xd9   :  { %v706_v0 = vsel %vm3726_vm2, %v1910_v21, %v1911_v45  ;;  %v3926_v35 = vsel %vm3070_vm5, 4294967295, %v3925_v35  ;;  %v668_v53 = vpop.permute.xlu1 %667  ;;  %vm3095_vm8 = vmpackc.low %vm767_vm4, %vm3932_vm10  ;;  %v3939_v7 = vsel %vm3109_vm6, 4294967295, %v3938_v7  ;;  %vm3941_vm10 = vcmp.lt.s32.totalorder %v2255_v29, 7 }
  0xda   :  { %v1919_v62 = vpop.permute.xlu0 %1918  ;;  %v1601_v47 = vpack.c.bf16 %v706_v0, %v671_v1  ;;  %v3934_v22 = vsel %vm3095_vm8, 4294967295, %v3933_v22  ;;  %vm3940_vm7 = vmmov %vm3930_vm15  ;;  %vm3950_vm2 = vcmp.lt.s32.totalorder %v2261_v31, 7  ;;  %vm3954_vm8 = vcmask 441344  }
  0xdb   :  { %v1921_v38 = vunpack.i.h.bf16 %v1919_v62  ;;  %v1920_v37 = vunpack.i.l.bf16 %v1919_v62  ;;  %vm3120_vm4 = vmand %vm3941_vm10, %vm3928_vm13  ;;  %vm3949_vm10 = vcmask 392192   ;;  %v3966_v1 = vmov 0 }
  0xdc   :  { %1602 = vmatprep.subr.msk.bf16.mxu0 %vm1600_vm14, %v1601_v47  ;;  %vm3103_vm14 = vmand %vm3935_vm12, %vm3898_vm9  ;;  %v3943_v55 = vsel %vm3120_vm4, 4294967295, %v3942_v55  ;;  %vm3132_vm12 = vcmp.lt.s32.totalorder %v39_v28, 7  ;;  %vm3738_vm4 = vcmask 384000   ;;  %v3979_v62 = vmov 0 }
  0xdd   :  { %v705_v34 = vsel %vm3930_vm15, %v1920_v37, %v1910_v21  ;;  %v707_v49 = vsel %vm3940_vm7, %v1911_v45, %v1921_v38  ;;  %v3114_v59 = vpop.permute.xlu1 %1923  ;;  %vm3126_vm15 = vcmp.lt.s32.totalorder %v36_v24, 7  ;;  %v3947_v16 = vsel %vm3132_vm12, 4294967295, %v3946_v16  ;;  %vm3144_vm3 = vmand %vm3950_vm2, %vm3929_vm0 }
  0xde   :  { %v703_v61 = vpop.permute.xlu0 %702  ;;  %v1604_v11 = vpack.c.bf16 %v705_v34, %v670_v2  ;;  %v3945_v10 = vsel %vm3126_vm15, 4294967295, %v3944_v10  ;;  %vm3948_vm7 = vcmask 441344   ;;  %v1926_v43 = vunpack.i.h.bf16 %v3114_v59 }
  0xdf   :  { %v673_v50 = vsel %vm3948_vm7, %v1916_v36, %v668_v53  ;;  %v1925_v52 = vunpack.i.l.bf16 %v3114_v59  ;;  %v708_v33 = vsel %vm3949_vm10, %v1921_v38, %v703_v61  ;;  %v3952_v9 = vsel %vm3144_vm3, 4294967295, %v3951_v9  ;;  %vm3953_vm7 = vmpackc.low %vm3040_vm1, %vm3898_vm9 }
  0xe0   :  { %v1685_v14 = vpack.c.bf16 %v708_v33, %v673_v50  ;;  %1605 = vmatpush1.bf16.msk.msra.mxu0 %vm3953_vm7, %v1604_v11  ;;  %v672_v24 = vsel %vm3954_vm8, %v1906_v20, %v1916_v36  ;;  %vm3955_vm10 = vcmp.ge.s32.totalorder %v2220_v17, 1  ;;  %vm3958_vm2 = vcmp.lt.s32.totalorder %v2240_v25, 7 }
  0xe1   :  { %vm3158_vm5 = vmand %vm3109_vm6, %vm3955_vm10  ;;  %v1688_v3 = vpack.c.bf16 %v707_v49, %v672_v24  ;;  %vm3961_vm1 = vcmp.ge.s32.totalorder %v2240_v25, 1  ;;  %v1934_v45 = vpop.permute.xlu1 %1933  ;;  %v755_v56 = vsel %vm3738_vm4, %v1925_v52, %v1926_v43  ;;  %v3972_v53 = vmov 0 }
  0xe2   :  { %vm3166_vm3 = vmpackc.low %vm3103_vm14, %vm3958_vm2  ;;  %v1929_v21 = vpop.permute.xlu0 %1928  ;;  %vm3965_vm14 = vcmp.ge.s32.totalorder %v2255_v29, 1  ;;  %v1935_v47 = vunpack.i.l.bf16 %v1934_v45  ;;  %v1936_v49 = vunpack.i.h.bf16 %v1934_v45  ;;  %v3990_v59 = vmov 0 }
  0xe3   :  { %vm3174_vm8 = vmand %vm3126_vm15, %vm3961_vm1  ;;  %v1931_v39 = vunpack.i.h.bf16 %v1929_v21  ;;  %v1930_v0 = vunpack.i.l.bf16 %v1929_v21  ;;  %vm3968_vm1 = vnez %v3926_v35  ;;  %vm3211_vm15 = vcmp.lt.s32.totalorder %v38_v30, 7 }
  0xe4   :  { %vm3964_vm10 = vmpackc.low %vm3061_vm11, %vm3928_vm13  ;;  %vm3970_vm11 = vcmp.lt.s32.totalorder %v2255_v29, 7  ;;  %v3975_v35 = vmov 0  ;;  %v4017_v28 = vmov 0  ;;  %v1786_v20 = vunpack.i.h.bf16 %v2511_v26 }
  0xe5   :  { %1686 = vmatprep.subr.msk.bf16.mxu1 %vm3964_vm10, %v1685_v14  ;;  %vm3187_vm2 = vmand %vm3132_vm12, %vm3965_vm14  ;;  %vm3971_vm10 = vnez %v3943_v55  ;;  %vm3974_vm14 = vnez %v3759_v27  ;;  %v3976_v35 = vsel %vm3211_vm15, 4294967295, %v3975_v35  ;;  %v752_v30 = vpop.permute.xlu1 %751  ;;  %v3994_v55 = vmov 0 }
  0xe6   :  { %v3967_v1 = vsel %vm3187_vm2, 4294967295, %v3966_v1  ;;  %vm3969_vm7 = vmpackc.low %vm3968_vm1, %vm3929_vm0  ;;  %vm3978_vm1 = vnez %v3952_v9  ;;  %vm3982_vm0 = vcmask 375808   ;;  %v1939_v38 = vpop.permute.xlu0 %1938 }
  0xe7   :  { %1689 = vmatpush1.bf16.msk.msra.mxu1 %vm3969_vm7, %v1688_v3  ;;  %vm3201_vm13 = vmpackc.low %vm3971_vm10, %vm3970_vm11  ;;  %vm3977_vm7 = vcmp.lt.s32.totalorder %v2261_v31, 7  ;;  %vm3981_vm11 = vnez %v3771_v40  ;;  %v790_v18 = vsel %vm3982_vm0, %v1930_v0, %v1931_v39  ;;  %v1941_v34 = vunpack.i.h.bf16 %v1939_v38 }
  0xe8   :  { %v3973_v53 = vsel %vm3201_vm13, 4294967295, %v3972_v53  ;;  %vm822_vm12 = vmand %vm3158_vm5, %vm3974_vm14  ;;  %vm3983_vm13 = vnez %v3775_v44  ;;  %v1607_v37 = vpack.c.bf16 %v790_v18, %v755_v56  ;;  %v1940_v2 = vunpack.i.l.bf16 %v1939_v38 }
  0xe9   :  { %vm3219_vm4 = vmpackc.low %vm3978_vm1, %vm3977_vm7  ;;  %vm3984_vm7 = vcmp.ge.s32.totalorder %v2261_v31, 1  ;;  %v1944_v33 = vpop.permute.xlu1 %1943 }
  0xea   :  { %v3980_v62 = vsel %vm3219_vm4, 4294967295, %v3979_v62  ;;  %vm821_vm10 = vmand %vm3174_vm8, %vm3981_vm11  ;;  %v787_v9 = vpop.permute.xlu0 %786  ;;  %v1946_v24 = vunpack.i.h.bf16 %v1944_v33  ;;  %v1945_v3 = vunpack.i.l.bf16 %v1944_v33 }
  0xeb   :  { %vm824_vm9 = vmand %vm3187_vm2, %vm3983_vm13  ;;  %vm3989_vm13 = vnez %v3934_v22  ;;  %v1761_v22 = vunpack.i.h.bf16 %v2312_v41 }
  0xec   :  { %vm3236_vm1 = vmand %vm3211_vm15, %vm3984_vm7  ;;  %1608 = vmatprep.subr.msk.bf16.mxu0 %vm3989_vm13, %v1607_v37  ;;  %vm3992_vm7 = vcmask 375808   ;;  %vm3993_vm15 = vcmask 384000  }
  0xed   :  { %vm3242_vm0 = vmpackc.low %vm3158_vm5, %vm822_vm12  ;;  %v789_v61 = vsel %vm3992_vm7, %v1940_v2, %v1930_v0  ;;  %v754_v11 = vsel %vm3993_vm15, %v1935_v47, %v1925_v52  ;;  %vm3998_vm15 = vnez %v3781_v54  ;;  %v2027_v47 = vld [vmem:[%s3678_s1 + $0x8] sm:$0xff] }
  0xee   :  { %v3988_v12 = vsel %vm3242_vm0, 4294967295, %v3987_v12  ;;  %vm3250_vm4 = vmpackc.low %vm3174_vm8, %vm821_vm10  ;;  %vm3996_vm0 = vnez %v3779_v48  ;;  %v1610_v14 = vpack.c.bf16 %v789_v61, %v754_v11  ;;  %v1949_v38 = vpop.permute.xlu0 %1948 }
  0xef   :  { %v3991_v59 = vsel %vm3250_vm4, 4294967295, %v3990_v59  ;;  %vm3258_vm12 = vmpackc.low %vm3187_vm2, %vm824_vm9  ;;  %vm4002_vm2 = vnez %v3788_v63  ;;  %vm4003_vm9 = vcmask 1039360   ;;  %v1950_v2 = vunpack.i.l.bf16 %v1949_v38 }
  0xf0   :  { %v3995_v55 = vsel %vm3258_vm12, 4294967295, %v3994_v55  ;;  %vm3997_vm10 = vmmov %vm3992_vm7  ;;  %vm3999_vm7 = vcmask 384000   ;;  %1611 = vmatpush1.bf16.msk.msra.mxu0 %vm3166_vm3, %v1610_v14  ;;  %vm4006_vm3 = vnez %v3973_v53  ;;  %v4013_v53 = vmov 0 }
  0xf1   :  { %v791_v50 = vsel %vm3997_vm10, %v1931_v39, %v1941_v34  ;;  %v757_v52 = vsel %vm3999_vm7, %v1936_v49, %v752_v30  ;;  %vm4000_vm12 = vmmov %vm3997_vm10  ;;  %v861_v39 = vsel %vm4003_vm9, %v1946_v24, %v1761_v22  ;;  %v1954_v30 = vpop.permute.xlu1 %1953  ;;  %v1791_v14 = vunpack.i.h.bf16 %v2569_v8 }
  0xf2   :  { %v792_v45 = vsel %vm4000_vm12, %v1941_v34, %v787_v9  ;;  %vm4001_vm10 = vmmov %vm3999_vm7  ;;  %vm4005_vm12 = vnez %v3945_v10  ;;  %v1616_v18 = vpack.c.bf16 %v861_v39, %v2027_v47  ;;  %v1951_v34 = vunpack.i.h.bf16 %v1949_v38 }
  0xf3   :  { %v1691_v41 = vpack.c.bf16 %v792_v45, %v757_v52  ;;  %v756_v21 = vsel %vm4001_vm10, %v1926_v43, %v1936_v49  ;;  %vm4004_vm4 = vmmov %vm4003_vm9  ;;  %vm4010_vm10 = vnez %v3980_v62  ;;  %v1956_v62 = vunpack.i.h.bf16 %v1954_v30 }
  0xf4   :  { %v862_v0 = vsel %vm4004_vm4, %v1761_v22, %v1945_v3  ;;  %v1694_v56 = vpack.c.bf16 %v791_v50, %v756_v21  ;;  %vm925_vm13 = vmand %vm4005_vm12, %vm3981_vm11  ;;  %v1955_v49 = vunpack.i.l.bf16 %v1954_v30  ;;  %v2029_v50 = vld [vmem:[%s3678_s1 + $0x18] sm:$0xff] }
  0xf5   :  { %v1613_v43 = vpack.c.bf16 %v862_v0, %v2026_v57  ;;  %1692 = vmatprep.subr.msk.bf16.mxu1 %vm4006_vm3, %v1691_v41  ;;  %vm4007_vm4 = vmand %vm3236_vm1, %vm3996_vm0  ;;  %v1964_v9 = vpop.permute.xlu1 %1963 }
  0xf6   :  { %vm3306_vm9 = vmpackc.low %vm3236_vm1, %vm4007_vm4  ;;  %1695 = vmatpush1.bf16.msk.msra.mxu1 %vm4010_vm10, %v1694_v56  ;;  %vm4015_vm4 = vnez %v3988_v12  ;;  %v2028_v12 = vld [vmem:[%s3678_s1 + $0x20] sm:$0xff]  ;;  %v1966_v26 = vunpack.i.h.bf16 %v1964_v9 }
  0xf7   :  { %vm4011_vm3 = vmand %vm3158_vm5, %vm3998_vm15  ;;  %1614 = vmatprep.subr.msk.bf16.mxu0 %vm4015_vm4, %v1613_v43  ;;  %vm4019_vm5 = vcmask 1039360   ;;  %vm4022_vm4 = vnez %v3797_v23 }
  0xf8   :  { %vm4012_vm7 = vmand %vm3109_vm6, %vm3974_vm14  ;;  %v863_v61 = vsel %vm4019_vm5, %v1945_v3, %v1950_v2  ;;  %vm4023_vm14 = vnez %v3967_v1  ;;  %v1965_v3 = vunpack.i.l.bf16 %v1964_v9 }
  0xf9   :  { %vm3322_vm11 = vmpackc.low %vm4012_vm7, %vm4011_vm3  ;;  %vm4021_vm3 = vnez %v3991_v59  ;;  %v1700_v33 = vpack.c.bf16 %v863_v61, %v2029_v50  ;;  %v1959_v59 = vpop.permute.xlu0 %1958  ;;  %v1974_v56 = vpop.permute.xlu1 %1973 }
  0xfa   :  { %v4014_v53 = vsel %vm3322_vm11, 4294967295, %v4013_v53  ;;  %vm4016_vm10 = vmand %vm3174_vm8, %vm4002_vm2  ;;  %1617 = vmatpush1.bf16.msk.msra.mxu0 %vm4021_vm3, %v1616_v18  ;;  %vm4024_vm8 = vnez %v3775_v44  ;;  %v1961_v52 = vunpack.i.h.bf16 %v1959_v59  ;;  %v1960_v24 = vunpack.i.l.bf16 %v1959_v59 }
  0xfb   :  { %vm3333_vm12 = vmpackc.low %vm925_vm13, %vm4016_vm10  ;;  %vm4025_vm13 = vnez %v3947_v16  ;;  %vm4027_vm3 = vnez %v3995_v55  ;;  %vm4028_vm11 = vnez %v3976_v35  ;;  %vm4031_vm2 = vcmask 982016  }
  0xfc   :  { %v4018_v28 = vsel %vm3333_vm12, 4294967295, %v4017_v28  ;;  %vm4020_vm7 = vmmov %vm4019_vm5  ;;  %vm4026_vm5 = vnez %v3803_v46  ;;  %v947_v41 = vsel %vm4031_vm2, %v1961_v52, %v1791_v14  ;;  %v1976_v36 = vunpack.i.h.bf16 %v1974_v56 }
  0xfd   :  { %v864_v11 = vsel %vm4020_vm7, %v1950_v2, %v1951_v34  ;;  %vm928_vm10 = vmand %vm4025_vm13, %vm4024_vm8  ;;  %vm4029_vm8 = vcmask 1031168   ;;  %v1969_v57 = vpop.permute.xlu0 %1968  ;;  %v1975_v38 = vunpack.i.l.bf16 %v1974_v56  ;;  %v1984_v61 = vpop.permute.xlu1 %1983 }
  0xfe   :  { %v1697_v22 = vpack.c.bf16 %v864_v11, %v2028_v12  ;;  %vm927_vm12 = vmand %vm4028_vm11, %vm3996_vm0  ;;  %v913_v45 = vsel %vm4029_vm8, %v1956_v62, %v1786_v20  ;;  %v916_v43 = vsel %vm4029_vm8, %v1965_v3, %v1966_v26  ;;  %v1971_v47 = vunpack.i.h.bf16 %v1969_v57 }
  0xff   :  { %vm4030_vm13 = vmmov %vm4029_vm8  ;;  %v1622_v0 = vpack.c.bf16 %v947_v41, %v913_v45  ;;  %v1970_v1 = vunpack.i.l.bf16 %v1969_v57  ;;  %v1985_v50 = vunpack.i.l.bf16 %v1984_v61 }
 0x100   :  { %1698 = vmatprep.subr.msk.bf16.mxu1 %vm4027_vm3, %v1697_v22  ;;  %v914_v8 = vsel %vm4030_vm13, %v1786_v20, %v1955_v49  ;;  %vm4032_vm6 = vmmov %vm4031_vm2  ;;  %v1986_v20 = vunpack.i.h.bf16 %v1984_v61 }
 0x101   :  { %v948_v21 = vsel %vm4032_vm6, %v1791_v14, %v1960_v24  ;;  %1701 = vmatpush1.bf16.msk.msra.mxu1 %vm3306_vm9, %v1700_v33  ;;  %vm4033_vm3 = vmand %vm4023_vm14, %vm4022_vm4  ;;  %vm4036_vm6 = vnez %v3939_v7  ;;  %v1979_v11 = vpop.permute.xlu0 %1978 }
 0x102   :  { %vm3378_vm7 = vmpackc.low %vm928_vm10, %vm4033_vm3  ;;  %v1619_v39 = vpack.c.bf16 %v948_v21, %v914_v8  ;;  %vm4041_vm10 = vnez %v4014_v53  ;;  %vm4042_vm3 = vnez %v3788_v63  ;;  %v1816_v53 = vunpack.i.h.bf16 %v2698_v5 }
 0x103   :  { %vm1008_vm2 = vmand %vm4036_vm6, %vm3998_vm15  ;;  %v1981_v12 = vunpack.i.h.bf16 %v1979_v11  ;;  %v1980_v22 = vunpack.i.l.bf16 %v1979_v11 }
 0x104   :  { %vm4037_vm14 = vmand %vm3236_vm1, %vm4026_vm5  ;;  %1620 = vmatprep.subr.msk.bf16.mxu0 %vm4041_vm10, %v1619_v39  ;;  %vm4044_vm1 = vcmask 982016   ;;  %vm4052_vm10 = vcmp.lt.s32.totalorder %v2220_v17, 7  ;;  %v2063_v17 = vmov 0.0  }
 0x105   :  { %vm3397_vm9 = vmpackc.low %vm927_vm12, %vm4037_vm14  ;;  %v949_v37 = vsel %vm4044_vm1, %v1960_v24, %v1970_v1  ;;  %vm4046_vm12 = vnez %v4018_v28  ;;  %v1821_v28 = vunpack.i.h.bf16 %v2754_v13  ;;  %v1994_v24 = vpop.permute.xlu1 %1993 }
 0x106   :  { %vm4040_vm13 = vmmov %vm4029_vm8  ;;  %vm4043_vm8 = vnez %v3945_v10  ;;  %1623 = vmatpush1.bf16.msk.msra.mxu0 %vm4046_vm12, %v1622_v0  ;;  %vm4055_vm12 = vcmask 973824   ;;  %v1996_v45 = vunpack.i.h.bf16 %v1994_v24  ;;  %v1995_v8 = vunpack.i.l.bf16 %v1994_v24 }
 0x107   :  { %v915_v30 = vsel %vm4040_vm13, %v1955_v49, %v1965_v3  ;;  %vm1007_vm15 = vmand %vm4043_vm8, %vm4042_vm3  ;;  %vm4049_vm13 = vnez %v3947_v16  ;;  %v995_v33 = vsel %vm4055_vm12, %v1976_v36, %v1816_v53  ;;  %v1989_v3 = vpop.permute.xlu0 %1988 }
 0x108   :  { %vm4045_vm5 = vmmov %vm4044_vm1  ;;  %v1706_v49 = vpack.c.bf16 %v949_v37, %v915_v30  ;;  %v1991_v41 = vunpack.i.h.bf16 %v1989_v3  ;;  %v1990_v21 = vunpack.i.l.bf16 %v1989_v3  ;;  %v1193_v3 = vld [vmem:[%s3680_s3] sm:$0xff] }
 0x109   :  { %v950_v34 = vsel %vm4045_vm5, %v1970_v1, %v1971_v47  ;;  %vm3414_vm14 = vmpackc.low %vm1008_vm2, %vm4036_vm6  ;;  %v2004_v57 = vpop.permute.xlu1 %2003 }
 0x10a   :  { %v1703_v62 = vpack.c.bf16 %v950_v34, %v916_v43  ;;  %vm1010_vm5 = vmand %vm4049_vm13, %vm4022_vm4  ;;  %v2005_v36 = vunpack.i.l.bf16 %v2004_v57 }
 0x10b   :  { %vm3431_vm2 = vmpackc.low %vm1007_vm15, %vm4043_vm8  ;;  %vm4057_vm15 = vcmask 965632   ;;  %v1999_v10 = vpop.permute.xlu0 %1998 }
 0x10c   :  { %1704 = vmatprep.subr.msk.bf16.mxu1 %vm3378_vm7, %v1703_v62  ;;  %vm3441_vm1 = vmand %vm4036_vm6, %vm4052_vm10  ;;  %v1029_v59 = vsel %vm4057_vm15, %v1981_v12, %v1821_v28  ;;  %vm4064_vm10 = vcmp.lt.s32.totalorder %v2240_v25, 7  ;;  %v2001_v1 = vunpack.i.h.bf16 %v1999_v10  ;;  %v2000_v18 = vunpack.i.l.bf16 %v1999_v10 }
 0x10d   :  { %vm4056_vm4 = vmmov %vm4055_vm12  ;;  %1707 = vmatpush1.bf16.msk.msra.mxu1 %vm3397_vm9, %v1706_v49  ;;  %v1628_v52 = vpack.c.bf16 %v1029_v59, %v995_v33  ;;  %vm4063_vm9 = vnez %v3759_v27 }
 0x10e   :  { %v996_v9 = vsel %vm4056_vm4, %v1816_v53, %v1975_v38  ;;  %vm4058_vm3 = vmmov %vm4057_vm15  ;;  %v1084_v53 = vpop.permute.xlu1 %1083 }
 0x10f   :  { %v1030_v14 = vsel %vm4058_vm3, %v1821_v28, %v1980_v22  ;;  %vm3453_vm7 = vmpackc.low %vm1010_vm5, %vm4049_vm13 }
 0x110   :  { %vm4061_vm6 = vmmov %vm4056_vm4  ;;  %v1625_v26 = vpack.c.bf16 %v1030_v14, %v996_v9  ;;  %vm4062_vm4 = vnez %v3803_v46 }
 0x111   :  { %v998_v7 = vsel %vm4061_vm6, %v1985_v50, %v1986_v20  ;;  %vm1009_vm3 = vmand %vm4028_vm11, %vm4062_vm4 }
 0x112   :  { %vm1059_vm5 = vmand %vm3441_vm1, %vm4063_vm9  ;;  %1626 = vmatprep.subr.msk.bf16.mxu0 %vm3414_vm14, %v1625_v26  ;;  %vm4072_vm9 = vcmask 916480   ;;  %v2014_v28 = vpop.permute.xlu1 %2013 }
 0x113   :  { %vm3472_vm12 = vmand %vm4043_vm8, %vm4064_vm10  ;;  %1629 = vmatpush1.bf16.msk.msra.mxu0 %vm3431_vm2, %v1628_v52  ;;  %v1086_v47 = vsel %vm4072_vm9, %v1995_v8, %v1996_v45  ;;  %vm4077_vm10 = vcmask 908288   ;;  %v1085_v35 = vsel %vm4072_vm9, %v2005_v36, %v1995_v8  ;;  %v2016_v12 = vunpack.i.h.bf16 %v2014_v28  ;;  %v1539_v8 = vld [vmem:[%s3680_s3 + $0x10] sm:$0xff] }
 0x114   :  { %vm4067_vm15 = vmmov %vm4061_vm6  ;;  %vm4068_vm6 = vcmask 965632   ;;  %v1219_v55 = vmul.f32 %v1539_v8, %v2537_v58 }
 0x115   :  { %v997_v39 = vsel %vm4067_vm15, %v1975_v38, %v1985_v50  ;;  %v1031_v0 = vsel %vm4068_vm6, %v1980_v22, %v1990_v21  ;;  %vm4069_vm4 = vmmov %vm4068_vm6  ;;  %v1116_v38 = vsel %vm4077_vm10, %v2000_v18, %v2001_v1  ;;  %vm4078_vm15 = vcmp.lt.s32.totalorder %v2261_v31, 7 }
 0x116   :  { %v1032_v27 = vsel %vm4069_vm4, %v1990_v21, %v1991_v41  ;;  %vm1711_vm14 = vmpackc.low %vm1009_vm3, %vm4028_vm11  ;;  %v1712_v25 = vpack.c.bf16 %v1031_v0, %v997_v39  ;;  %vm4073_vm4 = vnez %v3771_v40  ;;  %vm4074_vm3 = vcmp.lt.s32.totalorder %v2255_v29, 7  ;;  %v2009_v29 = vpop.permute.xlu0 %2008  ;;  %v1166_v14 = vpop.permute.xlu1 %1165 }
 0x117   :  { %v1709_v56 = vpack.c.bf16 %v1032_v27, %v998_v7  ;;  %vm3485_vm8 = vmpackc.low %vm3441_vm1, %vm1059_vm5  ;;  %v1631_v37 = vpack.c.bf16 %v1116_v38, %v1086_v47  ;;  %v2011_v34 = vunpack.i.h.bf16 %v2009_v29  ;;  %v2010_v2 = vunpack.i.l.bf16 %v2009_v29 }
 0x118   :  { %vm1058_vm2 = vmand %vm3472_vm12, %vm4073_vm4  ;;  %v2006_v31 = vunpack.i.h.bf16 %v2004_v57  ;;  %v2015_v22 = vunpack.i.l.bf16 %v2014_v28  ;;  %v1194_v41 = vmul.f32 %v1193_v3, %v2461_v6 }
 0x119   :  { %1710 = vmatprep.subr.msk.bf16.mxu1 %vm3453_vm7, %v1709_v56  ;;  %vm3500_vm5 = vmand %vm4049_vm13, %vm4074_vm3  ;;  %vm4083_vm7 = vnez %v3775_v44  ;;  %1632 = vmatprep.subr.msk.bf16.mxu0 %vm3485_vm8, %v1631_v37 }
 0x11a   :  { %1713 = vmatpush1.bf16.msk.msra.mxu1 %vm1711_vm14, %v1712_v25  ;;  %vm3509_vm6 = vmand %vm4028_vm11, %vm4078_vm15  ;;  %v1114_v61 = vpop.permute.xlu0 %1113 }
 0x11b   :  { %vm3515_vm13 = vmpackc.low %vm3472_vm12, %vm1058_vm2  ;;  %vm4085_vm2 = vnez %v3781_v54  ;;  %v1087_v54 = vsel %vm4072_vm9, %v1996_v45, %v2006_v31  ;;  %v1535_v45 = vld [vmem:[%s3680_s3 + $0x8] sm:$0xff] }
 0x11c   :  { %vm1061_vm14 = vmand %vm3500_vm5, %vm4083_vm7  ;;  %v1206_v21 = vmul.f32 %v1535_v45, %v2479_v32  ;;  %v1249_v28 = vmul.f32 %v1535_v45, %v2580_v19 }
 0x11d   :  { %vm1060_vm11 = vmand %vm3509_vm6, %vm3996_vm0 }
 0x11e   :  { %vm4084_vm4 = vmmov %vm4077_vm10  ;;  %v2019_v33 = vpop.permute.xlu0 %2018  ;;  %v1207_v0 = vadd.f32 %v1206_v21, %v1194_v41 }
 0x11f   :  { %v1115_v62 = vsel %vm4084_vm4, %v2010_v2, %v2000_v18  ;;  %vm1141_vm3 = vmand %vm3441_vm1, %vm4085_vm2  ;;  %vm4089_vm1 = vmmov 1   ;;  %v2021_v9 = vunpack.i.h.bf16 %v2019_v33  ;;  %v2020_v59 = vunpack.i.l.bf16 %v2019_v33 }
 0x120   :  { %vm4086_vm10 = vmmov %vm4084_vm4  ;;  %v1634_v49 = vpack.c.bf16 %v1115_v62, %v1085_v35  ;;  %v1220_v27 = vadd.f32 %v1219_v55, %v1207_v0 }
 0x121   :  { %v1117_v44 = vsel %vm4086_vm10, %v2001_v1, %v2011_v34  ;;  %vm1714_vm8 = vmpackc.low %vm3500_vm5, %vm1061_vm14  ;;  %vm4092_vm14 = vnez %v3788_v63  ;;  %vm4094_vm10 = vnez %v3797_v23 }
 0x122   :  { %vm4087_vm15 = vmmov %vm4072_vm9  ;;  %1635 = vmatpush1.bf16.msk.msra.mxu0 %vm3515_vm13, %v1634_v49  ;;  %v1718_v50 = vpack.c.bf16 %v1117_v44, %v1087_v54  ;;  %v1259_v54 = vmul.f32 %v1539_v8, %v2615_v51 }
 0x123   :  { %v1088_v48 = vsel %vm4087_vm15, %v2006_v31, %v1084_v53  ;;  %vm4088_vm7 = vmmov %vm4084_vm4 }
 0x124   :  { %v1118_v11 = vsel %vm4088_vm7, %v2011_v34, %v1114_v61  ;;  %vm1717_vm0 = vmpackc.low %vm3509_vm6, %vm1060_vm11  ;;  %vm4093_vm11 = vcmask 900096  }
 0x125   :  { %v1715_v20 = vpack.c.bf16 %v1118_v11, %v1088_v48  ;;  %vm3546_vm4 = vmpackc.low %vm4089_vm1, %vm1141_vm3  ;;  %v1168_v13 = vsel %vm4093_vm11, %v2015_v22, %v2016_v12  ;;  %vm4095_vm3 = vnez %v3803_v46  ;;  %v1240_v11 = vmul.f32 %v2565_v4, %v1193_v3 }
 0x126   :  { %vm1140_vm2 = vmand %vm3472_vm12, %vm4092_vm14  ;;  %v1637_v7 = vpack.c.bf16 %v2063_v17, %v1168_v13 }
 0x127   :  { %1716 = vmatprep.subr.msk.bf16.mxu1 %vm1714_vm8, %v1715_v20  ;;  %vm1143_vm13 = vmand %vm3500_vm5, %vm4094_vm10 }
 0x128   :  { %1719 = vmatpush1.bf16.msk.msra.mxu1 %vm1717_vm0, %v1718_v50  ;;  %vm1142_vm12 = vmand %vm3509_vm6, %vm4095_vm3  ;;  %1638 = vmatprep.subr.msk.bf16.mxu0 %vm3546_vm4, %v1637_v7  ;;  %v2064_v50 = vmov 0  }
 0x129   :  { %vm1639_vm15 = vmpackc.low %vm4089_vm1, %vm1140_vm2  ;;  %2022 = vset.pattern.permute.xlu1 %v2064_v50  ;;  %2023 = vset.pattern.permute.xlu0 %v2064_v50 }
 0x12a   :  { %vm4096_vm7 = vmmov %vm4093_vm11 }
 0x12b   :  { %v1169_v63 = vsel %vm4096_vm7, %v2016_v12, %v2021_v9  ;;  %vm4097_vm8 = vmmov %vm4096_vm7  ;;  %v1250_v12 = vadd.f32 %v1249_v28, %v1240_v11 }
 0x12c   :  { %v1167_v23 = vsel %vm4097_vm8, %v2020_v59, %v2015_v22  ;;  %vm4098_vm9 = vmmov %vm4096_vm7  ;;  %v1724_v46 = vpack.c.bf16 %v2063_v17, %v1169_v63 }
 0x12d   :  { %v1170_v26 = vsel %vm4098_vm9, %v2021_v9, %v1166_v14  ;;  %vm1720_vm5 = vmpackc.low %vm4089_vm1, %vm1143_vm13  ;;  %v1640_v24 = vpack.c.bf16 %v2063_v17, %v1167_v23  ;;  %v1260_v22 = vadd.f32 %v1259_v54, %v1250_v12 }
 0x12e   :  { %v1721_v52 = vpack.c.bf16 %v2063_v17, %v1170_v26  ;;  %vm1723_vm0 = vmpackc.low %vm4089_vm1, %vm1142_vm12 }
 0x12f   :  { %1641 = vmatpush1.bf16.msk.msra.mxu0 %vm1639_vm15, %v1640_v24 }
 0x130   :  { %1722 = vmatprep.subr.msk.bf16.mxu1 %vm1720_vm5, %v1721_v52 }
 0x131   :  { %1725 = vmatpush1.bf16.msk.msra.mxu1 %vm1723_vm0, %v1724_v46 }
 0x132   :  { %1366 = vmatmul.mubr.bf16.vlgmr.msra.gmra.mrb[0].mxu0 %v2867_v60 }
 0x134   :  { %1409 = vmatmul.mubr.bf16.vlgmr.msra.gmra.mrb[0].mxu1 %v2867_v60  ;;  %v1543_v60 = vld [vmem:[%s3680_s3 + $0x18] sm:$0xff] }
 0x135   :  { %v1232_v39 = vmul.f32 %v1543_v60, %v2589_v42  ;;  %v1269_v20 = vmul.f32 %v1543_v60, %v2672_v15 }
 0x137   :  { %v3589_v56 = vadd.f32 %v1232_v39, %v1220_v27  ;;  %v1270_v5 = vadd.f32 %v1269_v20, %v1260_v22 }
 0x139   :  { %v1447_v13 = vmul.f32 512.0, %v3589_v56  ;;  %v1448_v33 = vmul.f32 512.0, %v1270_v5  ;;  %v1451_v59 = vmul.f32 2.0, %v3589_v56  ;;  %v1452_v19 = vmul.f32 2.0, %v1270_v5 }
 0x13b   :  { %v1457_v15 = vmul.f32 %v1447_v13, %v3589_v56  ;;  %v1458_v24 = vmul.f32 %v1448_v33, %v1270_v5 }
 0x205   :  { %v3591_v25 = vpop.f32.mrb[0].mxu0 }
 0x206   :  { %v1429_v57 = vmul.f32 %v3591_v25, %v3591_v25  ;;  %v3595_v6 = vpop.f32.mrb[1].mxu0 }
 0x207   :  { %v3597_v32 = vpop.f32.mrb[0].mxu1  ;;  %v1419_v10 = vadd.f32 %v3595_v6, %v3591_v25  ;;  %v1430_v58 = vmul.f32 %v3595_v6, %v3595_v6  ;;  %v3603_v42 = vpop.f32.mrb[2].mxu0 }
 0x208   :  { %v3605_v43 = vpop.f32.mrb[1].mxu1  ;;  %v1431_v47 = vmul.f32 %v3597_v32, %v3597_v32  ;;  %v1433_v1 = vmul.f32 %v3603_v42, %v3603_v42  ;;  %v3611_v18 = vpop.f32.mrb[3].mxu0 }
 0x209   :  { %v3613_v30 = vpop.f32.mrb[2].mxu1  ;;  %v1424_v36 = vadd.f32 %v3611_v18, %v3603_v42  ;;  %v1434_v38 = vmul.f32 %v3611_v18, %v3611_v18  ;;  %v1420_v37 = vadd.f32 %v1419_v10, %v3597_v32  ;;  %v1437_v29 = vadd.f32 %v1430_v58, %v1429_v57  ;;  %v1556_v57 = vld [vmem:[%s3680_s3 + $0x20] sm:$0xff] }
 0x20a   :  { %v3619_v40 = vpop.f32.mrb[3].mxu1  ;;  %v1435_v34 = vmul.f32 %v3613_v30, %v3613_v30  ;;  %v1432_v31 = vmul.f32 %v3605_v43, %v3605_v43 }
 0x20b   :  { %v1442_v16 = vadd.f32 %v1434_v38, %v1433_v1  ;;  %v1421_v2 = vadd.f32 %v1420_v37, %v3605_v43  ;;  %v1425_v53 = vadd.f32 %v1424_v36, %v3613_v30  ;;  %v1438_v35 = vadd.f32 %v1437_v29, %v1431_v47  ;;  %v1557_v47 = vld [vmem:[%s3680_s3 + $0x28] sm:$0xff] }
 0x20c   :  { %v1436_v62 = vmul.f32 %v3619_v40, %v3619_v40 }
 0x20d   :  { %1422 = vadd.xlane.f32.xlu0 %v1421_v2  ;;  %v1426_v44 = vadd.f32 %v1425_v53, %v3619_v40  ;;  %v1443_v49 = vadd.f32 %v1442_v16, %v1435_v34  ;;  %v1439_v61 = vadd.f32 %v1438_v35, %v1432_v31 }
 0x20f   :  { %1427 = vadd.xlane.f32.xlu1 %v1426_v44  ;;  %v1444_v48 = vadd.f32 %v1443_v49, %v1436_v62 }
 0x211   :  { %1440 = vadd.xlane.f32.xlu0 %v1439_v61 }
 0x215   :  { %1445 = vadd.xlane.f32.xlu0 %v1444_v48 }
 0x29a   :  { %v1423_v9 = vpop.xlane.xlu0 %1422 }
 0x29b   :  { %v1449_v14 = vadd.f32 %v1447_v13, %v1423_v9  ;;  %v1453_v7 = vmul.f32 %v1451_v59, %v1423_v9 }
 0x29c   :  { %v1428_v4 = vpop.xlane.xlu1 %1427 }
 0x29d   :  { %v1450_v17 = vadd.f32 %v1448_v33, %v1428_v4  ;;  %v1454_v23 = vmul.f32 %v1452_v19, %v1428_v4 }
 0x29e   :  { %v1441_v51 = vpop.xlane.xlu0 %1440 }
 0x29f   :  { %v1461_v63 = vadd.f32 %v1450_v17, %v1449_v14  ;;  %v1455_v52 = vadd.f32 %v1453_v7, %v1441_v51 }
 0x2a1   :  { %v1463_v26 = vmul.f32 0.0009765625, %v1461_v63  ;;  %v1459_v41 = vadd.f32 %v1457_v15, %v1455_v52 }
 0x2a2   :  { %v1446_v46 = vpop.xlane.xlu0 %1445 }
 0x2a3   :  { %v1456_v3 = vadd.f32 %v1454_v23, %v1446_v46  ;;  %v1475_v45 = vsub.f32 %v1270_v5, %v1463_v26  ;;  %v1474_v8 = vsub.f32 %v3589_v56, %v1463_v26  ;;  %v1465_v55 = vmul.f32 %v1463_v26, %v1463_v26 }
 0x2a5   :  { %v1460_v21 = vadd.f32 %v1458_v24, %v1456_v3 }
 0x2a7   :  { %v1462_v60 = vadd.f32 %v1460_v21, %v1459_v41 }
 0x2a9   :  { %v1464_v39 = vmul.f32 0.0009765625, %v1462_v60 }
 0x2ab   :  { %v1466_v0 = vsub.f32 %v1464_v39, %v1465_v55 }
 0x2ad   :  { %v1469_v27 = vadd.f32 1e-05, %v1466_v0 }
 0x2af   :  { %2024 = vrsqrt.f32 %v1469_v27 }
 0x2b9   :  { %v2025_v10 = vpop.eup %2024 }
 0x2ba   :  { %v1471_v58 = vmul.f32 %v2025_v10, %v1556_v57 }
 0x2bc   :  { %1482 = vperm.xlu1 %2022, %v1471_v58   ;;  %v1477_v56 = vmul.f32 %v1475_v45, %v1471_v58  ;;  %v1476_v1 = vmul.f32 %v1474_v8, %v1471_v58 }
 0x2be   :  { %v1479_v36 = vadd.f32 %v1557_v47, %v1477_v56  ;;  %v1478_v38 = vadd.f32 %v1557_v47, %v1476_v1 }
 0x2c0   :  { %1500 = vperm.xlu1 %2022, %v1479_v36   ;;  %1495 = vperm.xlu0 %2023, %v1478_v38  }
 0x33b   :  { %v1483_v37 = vpop.permute.xlu1 %1482 }
 0x33c   :  { %v1489_v29 = vmul.f32 %v1483_v37, %v3603_v42  ;;  %v1490_v16 = vmul.f32 %v1483_v37, %v3611_v18  ;;  %v1491_v34 = vmul.f32 %v1483_v37, %v3613_v30  ;;  %v1492_v2 = vmul.f32 %v1483_v37, %v3619_v40 }
 0x33d   :  { %v1485_v31 = vmul.f32 %v1483_v37, %v3591_v25  ;;  %v1486_v35 = vmul.f32 %v1483_v37, %v3595_v6  ;;  %v1487_v62 = vmul.f32 %v1483_v37, %v3597_v32  ;;  %v1488_v44 = vmul.f32 %v1483_v37, %v3605_v43 }
 0x33f   :  { %v1501_v53 = vpop.permute.xlu1 %1500  ;;  %v1496_v49 = vpop.permute.xlu0 %1495 }
 0x340   :  { %v1507_v61 = vadd.f32 %v1501_v53, %v1489_v29  ;;  %v1508_v48 = vadd.f32 %v1501_v53, %v1490_v16  ;;  %v1509_v11 = vadd.f32 %v1501_v53, %v1491_v34  ;;  %v1510_v42 = vadd.f32 %v1501_v53, %v1492_v2 }
 0x341   :  { %v1503_v28 = vadd.f32 %v1496_v49, %v1485_v31  ;;  %v1504_v18 = vadd.f32 %v1496_v49, %v1486_v35  ;;  %v1505_v54 = vadd.f32 %v1496_v49, %v1487_v62  ;;  %v1506_v30 = vadd.f32 %v1496_v49, %v1488_v44 }
 0x342   :  { %v1515_v20 = vmax.f32 %v1507_v61, 0.0  ;;  %v1516_v40 = vmax.f32 %v1508_v48, 0.0  ;;  %v1517_v12 = vmax.f32 %v1509_v11, 0.0  ;;  %v1518_v22 = vmax.f32 %v1510_v42, 0.0 }
 0x343   :  { %v1511_v25 = vmax.f32 %v1503_v28, 0.0  ;;  %v1512_v5 = vmax.f32 %v1504_v18, 0.0  ;;  %v1513_v6 = vmax.f32 %v1505_v54, 0.0  ;;  %v1514_v50 = vmax.f32 %v1506_v30, 0.0 }
 0x344   :  { %1523 = vst [vmem:[%s3681_s4 + $0x20] sm:$0xff] %v1515_v20  ;;  %1524 = vst [vmem:[%s3681_s4 + $0x28] sm:$0xff] %v1516_v40 }
 0x345   :  { %1525 = vst [vmem:[%s3681_s4 + $0x30] sm:$0xff] %v1517_v12  ;;  %1526 = vst [vmem:[%s3681_s4 + $0x38] sm:$0xff] %v1518_v22 }
 0x346   :  { %1519 = vst [vmem:[%s3681_s4] sm:$0xff] %v1511_v25  ;;  %1520 = vst [vmem:[%s3681_s4 + $0x8] sm:$0xff] %v1512_v5 }
 0x347   :  { %1521 = vst [vmem:[%s3681_s4 + $0x10] sm:$0xff] %v1513_v6  ;;  %1522 = vst [vmem:[%s3681_s4 + $0x18] sm:$0xff] %v1514_v50 }
 0x348   :  { %1531 = vsyncpa [#allocation4], 1 }

</bundles_post_ra>
